<compile_context>
chip_gen: v7x
topology: tpu7x:2x2x1
jax: 0.10.0
libtpu: 0.0.40
codegen_flags: <defaults>
</compile_context>

<pallas_src>
import functools

import numpy as np
import jax
import jax.numpy as jnp
from jax.experimental import pallas as pl
from jax.experimental.pallas import tpu as pltpu


# --------------------------------------------------------------------------
# Fused 2-layer bidirectional GRU encoder kernel (one grid step = BT windows).
# --------------------------------------------------------------------------
def _encoder_gru_kernel(T, BT, H,
                        x_ref,
                        a0_ref, q0_ref, b0_ref, whh0_ref, bhn0_ref,
                        a1_ref, q1_ref, b1_ref, whh1_ref, bhn1_ref,
                        out_ref,
                        s0_ref):
    f32 = jnp.float32
    P = 2 * H            # packed (fwd|bwd) width           = 64
    # gate columns: [r_f|r_b | z_f|z_b | n_f|n_b], total 3P = 6H = 192

    def run_layer(gi_f, gi_b, w_hh, b_hhn, store_ref):
        # gi_f / gi_b: (T*BT, 6H) hoisted input projections (time-major rows).
        # Step s uses fwd input at time s and bwd input at time T-1-s.
        h = None
        for s in range(T):                        # static T -> fully unrolled
            rs = T - 1 - s
            g = gi_f[s * BT:(s + 1) * BT, :] + gi_b[rs * BT:(rs + 1) * BT, :]
            if h is None:                         # first step: h == 0
                rz = jax.nn.sigmoid(g[:, :2 * P])             # r|z, 128 lanes
                gh_n = b_hhn
            else:
                gh = jnp.dot(h, w_hh, preferred_element_type=f32)   # (BT, 6H)
                rz = jax.nn.sigmoid(g[:, :2 * P] + gh[:, :2 * P])
                gh_n = gh[:, 2 * P:] + b_hhn
            r = rz[:, :P]
            z = rz[:, P:]
            n = jnp.tanh(g[:, 2 * P:] + r * gh_n)
            h = (n - z * n) if s == 0 else (n + z * (h - n))
            if store_ref is not None:
                store_ref[s * BT:(s + 1) * BT, :] = h         # packed [hf|hb]
        return h                                  # final step: [h_n fwd | h_n bwd]

    x = x_ref[...]                                            # (T*BT, F)

    # --- Layer 0: hoisted input projections (fwd cols / bwd cols) -----------
    p0 = jnp.dot(x, a0_ref[...], preferred_element_type=f32) + b0_ref[...]
    q0 = jnp.dot(x, q0_ref[...], preferred_element_type=f32)
    h0 = run_layer(p0, q0, whh0_ref[...], bhn0_ref[...], s0_ref)

    # --- Layer 1: hoisted projections from the layer-0 scratch --------------
    # Scratch row s holds S[s] = [hf0(s) | hb0(T-1-s)]; a1/q1 are packed so
    # gi1[s] = S[s] @ a1 + S[T-1-s] @ q1 + b1 reproduces the PyTorch layer-1
    # inputs [hf0(t) | hb0(t)] for both directions.
    # TODO(synk): nn.GRU inter-layer dropout acts only in training mode; this
    # inference forward treats it as identity.
    s_all = s0_ref[...]                                       # (T*BT, 2H)
    p1 = jnp.dot(s_all, a1_ref[...], preferred_element_type=f32) + b1_ref[...]
    q1 = jnp.dot(s_all, q1_ref[...], preferred_element_type=f32)
    h1 = run_layer(p1, q1, whh1_ref[...], bhn1_ref[...], None)

    # hidden = cat(h_n[0], h_n[1], h_n[2], h_n[3]) -> (BT, 4H), 4H = 128 lanes
    out_ref[...] = jnp.concatenate([h0, h1], axis=1).astype(out_ref.dtype)


@functools.partial(jax.jit, static_argnames=("hidden_size", "batch_block"))
def encoder_forward(inputs, packed, *, hidden_size, batch_block=None):
    B, T, F = inputs.shape
    H = hidden_size
    if batch_block is None:
        # One block unless the batch is large; when splitting, keep the block
        # a multiple of 8 so sublane dims satisfy the (8,128) block rule.
        batch_block = 128 if (B > 128 and B % 128 == 0) else B
    BT = batch_block
    nb = B // BT
    assert nb * BT == B, "batch must be divisible by batch_block"
    assert nb == 1 or BT % 8 == 0, "batch_block must be a multiple of 8 when splitting"

    # Reorder rows so every grid block is a contiguous, time-major (T*BT, F)
    # slab (amortized XLA-side when batching many windows per call).
    x_tm = jnp.transpose(inputs, (1, 0, 2))                    # (T, B, F)
    x_blk = (x_tm.reshape(T, nb, BT, F)
                 .transpose(1, 0, 2, 3)
                 .reshape(nb * T * BT, F))

    kernel = functools.partial(_encoder_gru_kernel, T, BT, H)
    weights = [packed[k] for k in
               ("a0", "q0", "b0", "whh0", "bhn0",
                "a1", "q1", "b1", "whh1", "bhn1")]

    def full_spec(a):
        nd = a.ndim
        return pl.BlockSpec(a.shape, lambda b, nd=nd: (0,) * nd)

    return pl.pallas_call(
        kernel,
        grid=(nb,),
        out_shape=jax.ShapeDtypeStruct((B, 4 * H), inputs.dtype),
        in_specs=[pl.BlockSpec((T * BT, F), lambda b: (b, 0))]
                 + [full_spec(w) for w in weights],
        out_specs=pl.BlockSpec((BT, 4 * H), lambda b: (b, 0)),
        scratch_shapes=[pltpu.VMEM((T * BT, 2 * H), jnp.float32)],
        compiler_params=pltpu.CompilerParams(
            dimension_semantics=("parallel",)),
    )(x_blk, *weights)


# --------------------------------------------------------------------------
# One-time parameter packing into the lane-interleaved gate layout.
# --------------------------------------------------------------------------
def pack_params(raw, *, hidden):
    H = hidden
    G3 = 3 * H

    def icols(mf, mb):
        # (rows,3H) fwd + (rows,3H) bwd -> (rows,6H) [r_f|r_b|z_f|z_b|n_f|n_b]
        return jnp.concatenate([mf[:, 0:H], mb[:, 0:H],
                                mf[:, H:2 * H], mb[:, H:2 * H],
                                mf[:, 2 * H:], mb[:, 2 * H:]], axis=1)

    def ivec(vf, vb):
        return jnp.concatenate([vf[0:H], vb[0:H], vf[H:2 * H], vb[H:2 * H],
                                vf[2 * H:], vb[2 * H:]]).reshape(1, 6 * H)

    def bias_rz_folded(b_ih, b_hh):
        # Fold r/z parts of b_hh into the hoisted input bias; the n part must
        # stay inside the r*(...) term (added per step via bhn*).
        return b_ih + jnp.concatenate([b_hh[:2 * H], jnp.zeros((H,), b_hh.dtype)])

    def pack_whh(whh_f, whh_b):
        z = jnp.zeros((H, G3), jnp.float32)
        return jnp.concatenate([icols(whh_f.T, z), icols(z, whh_b.T)], axis=0)

    F = raw["w_ih_l0"].shape[1]
    zF = jnp.zeros((F, G3), jnp.float32)
    zH = jnp.zeros((H, G3), jnp.float32)

    w1f, w1b = raw["w_ih_l1"], raw["w_ih_l1r"]                # (3H, 2H)
    w1f_top, w1f_bot = w1f[:, :H].T, w1f[:, H:].T             # (H, 3H)
    w1b_top, w1b_bot = w1b[:, :H].T, w1b[:, H:].T

    return {
        # ----- layer 0 -----
        "a0": icols(raw["w_ih_l0"].T, zF),                    # x(t)      -> fwd cols
        "q0": icols(zF, raw["w_ih_l0r"].T),                   # x(T-1-t)  -> bwd cols
        "b0": ivec(bias_rz_folded(raw["b_ih_l0"], raw["b_hh_l0"]),
                   bias_rz_folded(raw["b_ih_l0r"], raw["b_hh_l0r"])),
        "whh0": pack_whh(raw["w_hh_l0"], raw["w_hh_l0r"]),
        "bhn0": jnp.concatenate([raw["b_hh_l0"][2 * H:],
                                 raw["b_hh_l0r"][2 * H:]]).reshape(1, 2 * H),
        # ----- layer 1 -----  (S[s] = [hf0(s) | hb0(T-1-s)])
        "a1": jnp.concatenate([icols(w1f_top, zH),            # hf0(s)     -> fwd cols
                               icols(zH, w1b_bot)], axis=0),  # hb0(T-1-s) -> bwd cols
        "q1": jnp.concatenate([icols(zH, w1b_top),            # hf0(T-1-s) -> bwd cols
                               icols(w1f_bot, zH)], axis=0),  # hb0(s)     -> fwd cols
        "b1": ivec(bias_rz_folded(raw["b_ih_l1"], raw["b_hh_l1"]),
                   bias_rz_folded(raw["b_ih_l1r"], raw["b_hh_l1r"])),
        "whh1": pack_whh(raw["w_hh_l1"], raw["w_hh_l1r"]),
        "bhn1": jnp.concatenate([raw["b_hh_l1"][2 * H:],
                                 raw["b_hh_l1r"][2 * H:]]).reshape(1, 2 * H),
    }


# --------------------------------------------------------------------------
# Pure-JAX reference mirroring the PyTorch 2-layer bidirectional GRU forward.
# --------------------------------------------------------------------------
def reference_forward(inputs, raw, *, hidden_size):
    B, T, _ = inputs.shape
    H = hidden_size

    def cell(xt, h, wih, whh, bih, bhh):
        gi = xt @ wih.T + bih
        gh = h @ whh.T + bhh
        r = jax.nn.sigmoid(gi[:, :H] + gh[:, :H])
        z = jax.nn.sigmoid(gi[:, H:2 * H] + gh[:, H:2 * H])
        n = jnp.tanh(gi[:, 2 * H:] + r * gh[:, 2 * H:])
        return (1 - z) * n + z * h

    def run_dir(x, wih, whh, bih, bhh, reverse):
        h = jnp.zeros((B, H), x.dtype)
        outs = [None] * T
        rng = range(T - 1, -1, -1) if reverse else range(T)
        for t in rng:
            h = cell(x[:, t], h, wih, whh, bih, bhh)
            outs[t] = h
        return jnp.stack(outs, axis=1), h

    out_f0, hf0 = run_dir(inputs, raw["w_ih_l0"], raw["w_hh_l0"],
                          raw["b_ih_l0"], raw["b_hh_l0"], False)
    out_b0, hb0 = run_dir(inputs, raw["w_ih_l0r"], raw["w_hh_l0r"],
                          raw["b_ih_l0r"], raw["b_hh_l0r"], True)
    x1 = jnp.concatenate([out_f0, out_b0], axis=-1)   # dropout = identity (eval)
    _, hf1 = run_dir(x1, raw["w_ih_l1"], raw["w_hh_l1"],
                     raw["b_ih_l1"], raw["b_hh_l1"], False)
    _, hb1 = run_dir(x1, raw["w_ih_l1r"], raw["w_hh_l1r"],
                     raw["b_ih_l1r"], raw["b_hh_l1r"], True)
    return jnp.concatenate([hf0, hb0, hf1, hb1], axis=1)


def init_params(key, *, num_features, hidden):
    H = hidden
    specs = [
        ("w_ih_l0", (3 * H, num_features)), ("w_hh_l0", (3 * H, H)),
        ("b_ih_l0", (3 * H,)), ("b_hh_l0", (3 * H,)),
        ("w_ih_l0r", (3 * H, num_features)), ("w_hh_l0r", (3 * H, H)),
        ("b_ih_l0r", (3 * H,)), ("b_hh_l0r", (3 * H,)),
        ("w_ih_l1", (3 * H, 2 * H)), ("w_hh_l1", (3 * H, H)),
        ("b_ih_l1", (3 * H,)), ("b_hh_l1", (3 * H,)),
        ("w_ih_l1r", (3 * H, 2 * H)), ("w_hh_l1r", (3 * H, H)),
        ("b_ih_l1r", (3 * H,)), ("b_hh_l1r", (3 * H,)),
    ]
    ks = jax.random.split(key, len(specs))
    bound = 1.0 / np.sqrt(H)
    return {name: jax.random.uniform(k, shape, jnp.float32, -bound, bound)
            for (name, shape), k in zip(specs, ks)}


if __name__ == "__main__":
    NUM_FEATURES = 12
    HIDDEN_SIZE_LAYER_1 = 32
    HIDDEN_SIZE_LAYER_2 = 20   # stored by the PyTorch module but unused in forward
    SEQ_LEN = 8
    BATCH = 2

    key = jax.random.PRNGKey(0)
    kp, ki = jax.random.split(key)
    raw = init_params(kp, num_features=NUM_FEATURES, hidden=HIDDEN_SIZE_LAYER_1)
    packed = pack_params(raw, hidden=HIDDEN_SIZE_LAYER_1)
    inputs = jax.random.normal(ki, (BATCH, SEQ_LEN, NUM_FEATURES), jnp.float32)

    out = encoder_forward(inputs, packed, hidden_size=HIDDEN_SIZE_LAYER_1)
    out = jax.block_until_ready(out)
    assert out.shape == (BATCH, 4 * HIDDEN_SIZE_LAYER_1), out.shape

    ref = reference_forward(inputs, raw, hidden_size=HIDDEN_SIZE_LAYER_1)
    np.testing.assert_allclose(np.asarray(out), np.asarray(ref),
                               rtol=2e-3, atol=2e-3)
    print("KERNEL_OK")
</pallas_src>

<mosaic_0001>
module attributes {stable_mosaic.version = 11 : i64} {
  func.func @_encoder_gru_kernel(%arg0: i32, %arg1: memref<16x12xf32, #tpu.memory_space<vmem>>, %arg2: memref<12x192xf32, #tpu.memory_space<vmem>>, %arg3: memref<12x192xf32, #tpu.memory_space<vmem>>, %arg4: memref<1x192xf32, #tpu.memory_space<vmem>>, %arg5: memref<64x192xf32, #tpu.memory_space<vmem>>, %arg6: memref<1x64xf32, #tpu.memory_space<vmem>>, %arg7: memref<64x192xf32, #tpu.memory_space<vmem>>, %arg8: memref<64x192xf32, #tpu.memory_space<vmem>>, %arg9: memref<1x192xf32, #tpu.memory_space<vmem>>, %arg10: memref<64x192xf32, #tpu.memory_space<vmem>>, %arg11: memref<1x64xf32, #tpu.memory_space<vmem>>, %arg12: memref<2x128xf32, #tpu.memory_space<vmem>>, %arg13: memref<16x64xf32, #tpu.memory_space<vmem>>) attributes {dimension_semantics = [#tpu.dimension_semantics<parallel>], iteration_bounds = array<i64: 1>, scalar_prefetch = 0 : i64, scratch_operands = 1 : i64, tpu.core_type = #tpu.core_type<tc>, window_params = [{transform_indices = @transform_0, window_bounds = array<i64: 16, 12>}, {pipeline_mode = #tpu.pipeline_mode<synchronous>, transform_indices = @transform_1, window_bounds = array<i64: 12, 192>}, {pipeline_mode = #tpu.pipeline_mode<synchronous>, transform_indices = @transform_2, window_bounds = array<i64: 12, 192>}, {pipeline_mode = #tpu.pipeline_mode<synchronous>, transform_indices = @transform_3, window_bounds = array<i64: 1, 192>}, {pipeline_mode = #tpu.pipeline_mode<synchronous>, transform_indices = @transform_4, window_bounds = array<i64: 64, 192>}, {pipeline_mode = #tpu.pipeline_mode<synchronous>, transform_indices = @transform_5, window_bounds = array<i64: 1, 64>}, {pipeline_mode = #tpu.pipeline_mode<synchronous>, transform_indices = @transform_6, window_bounds = array<i64: 64, 192>}, {pipeline_mode = #tpu.pipeline_mode<synchronous>, transform_indices = @transform_7, window_bounds = array<i64: 64, 192>}, {pipeline_mode = #tpu.pipeline_mode<synchronous>, transform_indices = @transform_8, window_bounds = array<i64: 1, 192>}, {pipeline_mode = #tpu.pipeline_mode<synchronous>, transform_indices = @transform_9, window_bounds = array<i64: 64, 192>}, {pipeline_mode = #tpu.pipeline_mode<synchronous>, transform_indices = @transform_10, window_bounds = array<i64: 1, 64>}, {transform_indices = @transform_11, window_bounds = array<i64: 2, 128>}]} {
    %c0 = arith.constant 0 : index
    %c0_0 = arith.constant 0 : index
    %0 = vector.load %arg1[%c0, %c0_0] : memref<16x12xf32, #tpu.memory_space<vmem>>, vector<16x12xf32>
    %c0_1 = arith.constant 0 : index
    %c0_2 = arith.constant 0 : index
    %1 = vector.load %arg2[%c0_1, %c0_2] : memref<12x192xf32, #tpu.memory_space<vmem>>, vector<12x192xf32>
    %cst = arith.constant dense<0.000000e+00> : vector<16x192xf32>
    %2 = tpu.matmul %0, %1, %cst {dimension_numbers = #tpu.dot_dimension_numbers<[1], [0], [0], [1], [0, 0, 1, 1], [], []>} : vector<16x12xf32>, vector<12x192xf32>, vector<16x192xf32> -> vector<16x192xf32>
    %c0_3 = arith.constant 0 : index
    %c0_4 = arith.constant 0 : index
    %3 = vector.load %arg4[%c0_3, %c0_4] : memref<1x192xf32, #tpu.memory_space<vmem>>, vector<1x192xf32>
    %4 = vector.broadcast %3 : vector<1x192xf32> to vector<16x192xf32>
    %5 = arith.addf %2, %4 : vector<16x192xf32>
    %c0_5 = arith.constant 0 : index
    %c0_6 = arith.constant 0 : index
    %6 = vector.load %arg3[%c0_5, %c0_6] : memref<12x192xf32, #tpu.memory_space<vmem>>, vector<12x192xf32>
    %cst_7 = arith.constant dense<0.000000e+00> : vector<16x192xf32>
    %7 = tpu.matmul %0, %6, %cst_7 {dimension_numbers = #tpu.dot_dimension_numbers<[1], [0], [0], [1], [0, 0, 1, 1], [], []>} : vector<16x12xf32>, vector<12x192xf32>, vector<16x192xf32> -> vector<16x192xf32>
    %c0_8 = arith.constant 0 : index
    %c0_9 = arith.constant 0 : index
    %8 = vector.load %arg5[%c0_8, %c0_9] : memref<64x192xf32, #tpu.memory_space<vmem>>, vector<64x192xf32>
    %c0_10 = arith.constant 0 : index
    %c0_11 = arith.constant 0 : index
    %9 = vector.load %arg6[%c0_10, %c0_11] : memref<1x64xf32, #tpu.memory_space<vmem>>, vector<1x64xf32>
    %10 = vector.extract_strided_slice %5 {offsets = [0, 0], sizes = [2, 192], strides = [1, 1]} : vector<16x192xf32> to vector<2x192xf32>
    %11 = vector.extract_strided_slice %7 {offsets = [14, 0], sizes = [2, 192], strides = [1, 1]} : vector<16x192xf32> to vector<2x192xf32>
    %12 = arith.addf %10, %11 : vector<2x192xf32>
    %13 = vector.extract_strided_slice %12 {offsets = [0, 0], sizes = [2, 128], strides = [1, 1]} : vector<2x192xf32> to vector<2x128xf32>
    %14 = arith.negf %13 : vector<2x128xf32>
    %15 = math.exp %14 : vector<2x128xf32>
    %cst_12 = arith.constant 1.000000e+00 : f32
    %16 = vector.broadcast %cst_12 : f32 to vector<2x128xf32>
    %17 = arith.addf %16, %15 : vector<2x128xf32>
    %18 = arith.divf %16, %17 : vector<2x128xf32>
    %19 = vector.extract_strided_slice %18 {offsets = [0, 0], sizes = [2, 64], strides = [1, 1]} : vector<2x128xf32> to vector<2x64xf32>
    %20 = vector.extract_strided_slice %18 {offsets = [0, 64], sizes = [2, 64], strides = [1, 1]} : vector<2x128xf32> to vector<2x64xf32>
    %21 = vector.extract_strided_slice %12 {offsets = [0, 128], sizes = [2, 64], strides = [1, 1]} : vector<2x192xf32> to vector<2x64xf32>
    %22 = vector.broadcast %9 : vector<1x64xf32> to vector<2x64xf32>
    %23 = arith.mulf %19, %22 : vector<2x64xf32>
    %24 = arith.addf %21, %23 : vector<2x64xf32>
    %25 = math.tanh %24 : vector<2x64xf32>
    %26 = arith.mulf %20, %25 : vector<2x64xf32>
    %27 = arith.subf %25, %26 : vector<2x64xf32>
    %c0_13 = arith.constant 0 : index
    %c0_14 = arith.constant 0 : index
    %28 = vector.load %arg13[%c0_13, %c0_14] : memref<16x64xf32, #tpu.memory_space<vmem>>, vector<2x64xf32>
    tpu.vector_store %arg13[%c0_13, %c0_14], %27 {strides = array<i32>} : memref<16x64xf32, #tpu.memory_space<vmem>>, vector<2x64xf32>,
    %29 = vector.extract_strided_slice %5 {offsets = [2, 0], sizes = [2, 192], strides = [1, 1]} : vector<16x192xf32> to vector<2x192xf32>
    %30 = vector.extract_strided_slice %7 {offsets = [12, 0], sizes = [2, 192], strides = [1, 1]} : vector<16x192xf32> to vector<2x192xf32>
    %31 = arith.addf %29, %30 : vector<2x192xf32>
    %cst_15 = arith.constant dense<0.000000e+00> : vector<2x192xf32>
    %32 = tpu.matmul %27, %8, %cst_15 {dimension_numbers = #tpu.dot_dimension_numbers<[1], [0], [0], [1], [0, 0, 1, 1], [], []>} : vector<2x64xf32>, vector<64x192xf32>, vector<2x192xf32> -> vector<2x192xf32>
    %33 = vector.extract_strided_slice %31 {offsets = [0, 0], sizes = [2, 128], strides = [1, 1]} : vector<2x192xf32> to vector<2x128xf32>
    %34 = vector.extract_strided_slice %32 {offsets = [0, 0], sizes = [2, 128], strides = [1, 1]} : vector<2x192xf32> to vector<2x128xf32>
    %35 = arith.addf %33, %34 : vector<2x128xf32>
    %36 = arith.negf %35 : vector<2x128xf32>
    %37 = math.exp %36 : vector<2x128xf32>
    %cst_16 = arith.constant 1.000000e+00 : f32
    %38 = vector.broadcast %cst_16 : f32 to vector<2x128xf32>
    %39 = arith.addf %38, %37 : vector<2x128xf32>
    %40 = arith.divf %38, %39 : vector<2x128xf32>
    %41 = vector.extract_strided_slice %32 {offsets = [0, 128], sizes = [2, 64], strides = [1, 1]} : vector<2x192xf32> to vector<2x64xf32>
    %42 = vector.broadcast %9 : vector<1x64xf32> to vector<2x64xf32>
    %43 = arith.addf %41, %42 : vector<2x64xf32>
    %44 = vector.extract_strided_slice %40 {offsets = [0, 0], sizes = [2, 64], strides = [1, 1]} : vector<2x128xf32> to vector<2x64xf32>
    %45 = vector.extract_strided_slice %40 {offsets = [0, 64], sizes = [2, 64], strides = [1, 1]} : vector<2x128xf32> to vector<2x64xf32>
    %46 = vector.extract_strided_slice %31 {offsets = [0, 128], sizes = [2, 64], strides = [1, 1]} : vector<2x192xf32> to vector<2x64xf32>
    %47 = arith.mulf %44, %43 : vector<2x64xf32>
    %48 = arith.addf %46, %47 : vector<2x64xf32>
    %49 = math.tanh %48 : vector<2x64xf32>
    %50 = arith.subf %27, %49 : vector<2x64xf32>
    %51 = arith.mulf %45, %50 : vector<2x64xf32>
    %52 = arith.addf %49, %51 : vector<2x64xf32>
    %c2 = arith.constant 2 : index
    %c0_17 = arith.constant 0 : index
    %53 = vector.load %arg13[%c2, %c0_17] : memref<16x64xf32, #tpu.memory_space<vmem>>, vector<2x64xf32>
    tpu.vector_store %arg13[%c2, %c0_17], %52 {strides = array<i32>} : memref<16x64xf32, #tpu.memory_space<vmem>>, vector<2x64xf32>,
    %54 = vector.extract_strided_slice %5 {offsets = [4, 0], sizes = [2, 192], strides = [1, 1]} : vector<16x192xf32> to vector<2x192xf32>
    %55 = vector.extract_strided_slice %7 {offsets = [10, 0], sizes = [2, 192], strides = [1, 1]} : vector<16x192xf32> to vector<2x192xf32>
    %56 = arith.addf %54, %55 : vector<2x192xf32>
    %cst_18 = arith.constant dense<0.000000e+00> : vector<2x192xf32>
    %57 = tpu.matmul %52, %8, %cst_18 {dimension_numbers = #tpu.dot_dimension_numbers<[1], [0], [0], [1], [0, 0, 1, 1], [], []>} : vector<2x64xf32>, vector<64x192xf32>, vector<2x192xf32> -> vector<2x192xf32>
    %58 = vector.extract_strided_slice %56 {offsets = [0, 0], sizes = [2, 128], strides = [1, 1]} : vector<2x192xf32> to vector<2x128xf32>
    %59 = vector.extract_strided_slice %57 {offsets = [0, 0], sizes = [2, 128], strides = [1, 1]} : vector<2x192xf32> to vector<2x128xf32>
    %60 = arith.addf %58, %59 : vector<2x128xf32>
    %61 = arith.negf %60 : vector<2x128xf32>
    %62 = math.exp %61 : vector<2x128xf32>
    %cst_19 = arith.constant 1.000000e+00 : f32
    %63 = vector.broadcast %cst_19 : f32 to vector<2x128xf32>
    %64 = arith.addf %63, %62 : vector<2x128xf32>
    %65 = arith.divf %63, %64 : vector<2x128xf32>
    %66 = vector.extract_strided_slice %57 {offsets = [0, 128], sizes = [2, 64], strides = [1, 1]} : vector<2x192xf32> to vector<2x64xf32>
    %67 = vector.broadcast %9 : vector<1x64xf32> to vector<2x64xf32>
    %68 = arith.addf %66, %67 : vector<2x64xf32>
    %69 = vector.extract_strided_slice %65 {offsets = [0, 0], sizes = [2, 64], strides = [1, 1]} : vector<2x128xf32> to vector<2x64xf32>
    %70 = vector.extract_strided_slice %65 {offsets = [0, 64], sizes = [2, 64], strides = [1, 1]} : vector<2x128xf32> to vector<2x64xf32>
    %71 = vector.extract_strided_slice %56 {offsets = [0, 128], sizes = [2, 64], strides = [1, 1]} : vector<2x192xf32> to vector<2x64xf32>
    %72 = arith.mulf %69, %68 : vector<2x64xf32>
    %73 = arith.addf %71, %72 : vector<2x64xf32>
    %74 = math.tanh %73 : vector<2x64xf32>
    %75 = arith.subf %52, %74 : vector<2x64xf32>
    %76 = arith.mulf %70, %75 : vector<2x64xf32>
    %77 = arith.addf %74, %76 : vector<2x64xf32>
    %c4 = arith.constant 4 : index
    %c0_20 = arith.constant 0 : index
    %78 = vector.load %arg13[%c4, %c0_20] : memref<16x64xf32, #tpu.memory_space<vmem>>, vector<2x64xf32>
    tpu.vector_store %arg13[%c4, %c0_20], %77 {strides = array<i32>} : memref<16x64xf32, #tpu.memory_space<vmem>>, vector<2x64xf32>,
    %79 = vector.extract_strided_slice %5 {offsets = [6, 0], sizes = [2, 192], strides = [1, 1]} : vector<16x192xf32> to vector<2x192xf32>
    %80 = vector.extract_strided_slice %7 {offsets = [8, 0], sizes = [2, 192], strides = [1, 1]} : vector<16x192xf32> to vector<2x192xf32>
    %81 = arith.addf %79, %80 : vector<2x192xf32>
    %cst_21 = arith.constant dense<0.000000e+00> : vector<2x192xf32>
    %82 = tpu.matmul %77, %8, %cst_21 {dimension_numbers = #tpu.dot_dimension_numbers<[1], [0], [0], [1], [0, 0, 1, 1], [], []>} : vector<2x64xf32>, vector<64x192xf32>, vector<2x192xf32> -> vector<2x192xf32>
    %83 = vector.extract_strided_slice %81 {offsets = [0, 0], sizes = [2, 128], strides = [1, 1]} : vector<2x192xf32> to vector<2x128xf32>
    %84 = vector.extract_strided_slice %82 {offsets = [0, 0], sizes = [2, 128], strides = [1, 1]} : vector<2x192xf32> to vector<2x128xf32>
    %85 = arith.addf %83, %84 : vector<2x128xf32>
    %86 = arith.negf %85 : vector<2x128xf32>
    %87 = math.exp %86 : vector<2x128xf32>
    %cst_22 = arith.constant 1.000000e+00 : f32
    %88 = vector.broadcast %cst_22 : f32 to vector<2x128xf32>
    %89 = arith.addf %88, %87 : vector<2x128xf32>
    %90 = arith.divf %88, %89 : vector<2x128xf32>
    %91 = vector.extract_strided_slice %82 {offsets = [0, 128], sizes = [2, 64], strides = [1, 1]} : vector<2x192xf32> to vector<2x64xf32>
    %92 = vector.broadcast %9 : vector<1x64xf32> to vector<2x64xf32>
    %93 = arith.addf %91, %92 : vector<2x64xf32>
    %94 = vector.extract_strided_slice %90 {offsets = [0, 0], sizes = [2, 64], strides = [1, 1]} : vector<2x128xf32> to vector<2x64xf32>
    %95 = vector.extract_strided_slice %90 {offsets = [0, 64], sizes = [2, 64], strides = [1, 1]} : vector<2x128xf32> to vector<2x64xf32>
    %96 = vector.extract_strided_slice %81 {offsets = [0, 128], sizes = [2, 64], strides = [1, 1]} : vector<2x192xf32> to vector<2x64xf32>
    %97 = arith.mulf %94, %93 : vector<2x64xf32>
    %98 = arith.addf %96, %97 : vector<2x64xf32>
    %99 = math.tanh %98 : vector<2x64xf32>
    %100 = arith.subf %77, %99 : vector<2x64xf32>
    %101 = arith.mulf %95, %100 : vector<2x64xf32>
    %102 = arith.addf %99, %101 : vector<2x64xf32>
    %c6 = arith.constant 6 : index
    %c0_23 = arith.constant 0 : index
    %103 = vector.load %arg13[%c6, %c0_23] : memref<16x64xf32, #tpu.memory_space<vmem>>, vector<2x64xf32>
    tpu.vector_store %arg13[%c6, %c0_23], %102 {strides = array<i32>} : memref<16x64xf32, #tpu.memory_space<vmem>>, vector<2x64xf32>,
    %104 = vector.extract_strided_slice %5 {offsets = [8, 0], sizes = [2, 192], strides = [1, 1]} : vector<16x192xf32> to vector<2x192xf32>
    %105 = vector.extract_strided_slice %7 {offsets = [6, 0], sizes = [2, 192], strides = [1, 1]} : vector<16x192xf32> to vector<2x192xf32>
    %106 = arith.addf %104, %105 : vector<2x192xf32>
    %cst_24 = arith.constant dense<0.000000e+00> : vector<2x192xf32>
    %107 = tpu.matmul %102, %8, %cst_24 {dimension_numbers = #tpu.dot_dimension_numbers<[1], [0], [0], [1], [0, 0, 1, 1], [], []>} : vector<2x64xf32>, vector<64x192xf32>, vector<2x192xf32> -> vector<2x192xf32>
    %108 = vector.extract_strided_slice %106 {offsets = [0, 0], sizes = [2, 128], strides = [1, 1]} : vector<2x192xf32> to vector<2x128xf32>
    %109 = vector.extract_strided_slice %107 {offsets = [0, 0], sizes = [2, 128], strides = [1, 1]} : vector<2x192xf32> to vector<2x128xf32>
    %110 = arith.addf %108, %109 : vector<2x128xf32>
    %111 = arith.negf %110 : vector<2x128xf32>
    %112 = math.exp %111 : vector<2x128xf32>
    %cst_25 = arith.constant 1.000000e+00 : f32
    %113 = vector.broadcast %cst_25 : f32 to vector<2x128xf32>
    %114 = arith.addf %113, %112 : vector<2x128xf32>
    %115 = arith.divf %113, %114 : vector<2x128xf32>
    %116 = vector.extract_strided_slice %107 {offsets = [0, 128], sizes = [2, 64], strides = [1, 1]} : vector<2x192xf32> to vector<2x64xf32>
    %117 = vector.broadcast %9 : vector<1x64xf32> to vector<2x64xf32>
    %118 = arith.addf %116, %117 : vector<2x64xf32>
    %119 = vector.extract_strided_slice %115 {offsets = [0, 0], sizes = [2, 64], strides = [1, 1]} : vector<2x128xf32> to vector<2x64xf32>
    %120 = vector.extract_strided_slice %115 {offsets = [0, 64], sizes = [2, 64], strides = [1, 1]} : vector<2x128xf32> to vector<2x64xf32>
    %121 = vector.extract_strided_slice %106 {offsets = [0, 128], sizes = [2, 64], strides = [1, 1]} : vector<2x192xf32> to vector<2x64xf32>
    %122 = arith.mulf %119, %118 : vector<2x64xf32>
    %123 = arith.addf %121, %122 : vector<2x64xf32>
    %124 = math.tanh %123 : vector<2x64xf32>
    %125 = arith.subf %102, %124 : vector<2x64xf32>
    %126 = arith.mulf %120, %125 : vector<2x64xf32>
    %127 = arith.addf %124, %126 : vector<2x64xf32>
    %c8 = arith.constant 8 : index
    %c0_26 = arith.constant 0 : index
    %128 = vector.load %arg13[%c8, %c0_26] : memref<16x64xf32, #tpu.memory_space<vmem>>, vector<2x64xf32>
    tpu.vector_store %arg13[%c8, %c0_26], %127 {strides = array<i32>} : memref<16x64xf32, #tpu.memory_space<vmem>>, vector<2x64xf32>,
    %129 = vector.extract_strided_slice %5 {offsets = [10, 0], sizes = [2, 192], strides = [1, 1]} : vector<16x192xf32> to vector<2x192xf32>
    %130 = vector.extract_strided_slice %7 {offsets = [4, 0], sizes = [2, 192], strides = [1, 1]} : vector<16x192xf32> to vector<2x192xf32>
    %131 = arith.addf %129, %130 : vector<2x192xf32>
    %cst_27 = arith.constant dense<0.000000e+00> : vector<2x192xf32>
    %132 = tpu.matmul %127, %8, %cst_27 {dimension_numbers = #tpu.dot_dimension_numbers<[1], [0], [0], [1], [0, 0, 1, 1], [], []>} : vector<2x64xf32>, vector<64x192xf32>, vector<2x192xf32> -> vector<2x192xf32>
    %133 = vector.extract_strided_slice %131 {offsets = [0, 0], sizes = [2, 128], strides = [1, 1]} : vector<2x192xf32> to vector<2x128xf32>
    %134 = vector.extract_strided_slice %132 {offsets = [0, 0], sizes = [2, 128], strides = [1, 1]} : vector<2x192xf32> to vector<2x128xf32>
    %135 = arith.addf %133, %134 : vector<2x128xf32>
    %136 = arith.negf %135 : vector<2x128xf32>
    %137 = math.exp %136 : vector<2x128xf32>
    %cst_28 = arith.constant 1.000000e+00 : f32
    %138 = vector.broadcast %cst_28 : f32 to vector<2x128xf32>
    %139 = arith.addf %138, %137 : vector<2x128xf32>
    %140 = arith.divf %138, %139 : vector<2x128xf32>
    %141 = vector.extract_strided_slice %132 {offsets = [0, 128], sizes = [2, 64], strides = [1, 1]} : vector<2x192xf32> to vector<2x64xf32>
    %142 = vector.broadcast %9 : vector<1x64xf32> to vector<2x64xf32>
    %143 = arith.addf %141, %142 : vector<2x64xf32>
    %144 = vector.extract_strided_slice %140 {offsets = [0, 0], sizes = [2, 64], strides = [1, 1]} : vector<2x128xf32> to vector<2x64xf32>
    %145 = vector.extract_strided_slice %140 {offsets = [0, 64], sizes = [2, 64], strides = [1, 1]} : vector<2x128xf32> to vector<2x64xf32>
    %146 = vector.extract_strided_slice %131 {offsets = [0, 128], sizes = [2, 64], strides = [1, 1]} : vector<2x192xf32> to vector<2x64xf32>
    %147 = arith.mulf %144, %143 : vector<2x64xf32>
    %148 = arith.addf %146, %147 : vector<2x64xf32>
    %149 = math.tanh %148 : vector<2x64xf32>
    %150 = arith.subf %127, %149 : vector<2x64xf32>
    %151 = arith.mulf %145, %150 : vector<2x64xf32>
    %152 = arith.addf %149, %151 : vector<2x64xf32>
    %c10 = arith.constant 10 : index
    %c0_29 = arith.constant 0 : index
    %153 = vector.load %arg13[%c10, %c0_29] : memref<16x64xf32, #tpu.memory_space<vmem>>, vector<2x64xf32>
    tpu.vector_store %arg13[%c10, %c0_29], %152 {strides = array<i32>} : memref<16x64xf32, #tpu.memory_space<vmem>>, vector<2x64xf32>,
    %154 = vector.extract_strided_slice %5 {offsets = [12, 0], sizes = [2, 192], strides = [1, 1]} : vector<16x192xf32> to vector<2x192xf32>
    %155 = vector.extract_strided_slice %7 {offsets = [2, 0], sizes = [2, 192], strides = [1, 1]} : vector<16x192xf32> to vector<2x192xf32>
    %156 = arith.addf %154, %155 : vector<2x192xf32>
    %cst_30 = arith.constant dense<0.000000e+00> : vector<2x192xf32>
    %157 = tpu.matmul %152, %8, %cst_30 {dimension_numbers = #tpu.dot_dimension_numbers<[1], [0], [0], [1], [0, 0, 1, 1], [], []>} : vector<2x64xf32>, vector<64x192xf32>, vector<2x192xf32> -> vector<2x192xf32>
    %158 = vector.extract_strided_slice %156 {offsets = [0, 0], sizes = [2, 128], strides = [1, 1]} : vector<2x192xf32> to vector<2x128xf32>
    %159 = vector.extract_strided_slice %157 {offsets = [0, 0], sizes = [2, 128], strides = [1, 1]} : vector<2x192xf32> to vector<2x128xf32>
    %160 = arith.addf %158, %159 : vector<2x128xf32>
    %161 = arith.negf %160 : vector<2x128xf32>
    %162 = math.exp %161 : vector<2x128xf32>
    %cst_31 = arith.constant 1.000000e+00 : f32
    %163 = vector.broadcast %cst_31 : f32 to vector<2x128xf32>
    %164 = arith.addf %163, %162 : vector<2x128xf32>
    %165 = arith.divf %163, %164 : vector<2x128xf32>
    %166 = vector.extract_strided_slice %157 {offsets = [0, 128], sizes = [2, 64], strides = [1, 1]} : vector<2x192xf32> to vector<2x64xf32>
    %167 = vector.broadcast %9 : vector<1x64xf32> to vector<2x64xf32>
    %168 = arith.addf %166, %167 : vector<2x64xf32>
    %169 = vector.extract_strided_slice %165 {offsets = [0, 0], sizes = [2, 64], strides = [1, 1]} : vector<2x128xf32> to vector<2x64xf32>
    %170 = vector.extract_strided_slice %165 {offsets = [0, 64], sizes = [2, 64], strides = [1, 1]} : vector<2x128xf32> to vector<2x64xf32>
    %171 = vector.extract_strided_slice %156 {offsets = [0, 128], sizes = [2, 64], strides = [1, 1]} : vector<2x192xf32> to vector<2x64xf32>
    %172 = arith.mulf %169, %168 : vector<2x64xf32>
    %173 = arith.addf %171, %172 : vector<2x64xf32>
    %174 = math.tanh %173 : vector<2x64xf32>
    %175 = arith.subf %152, %174 : vector<2x64xf32>
    %176 = arith.mulf %170, %175 : vector<2x64xf32>
    %177 = arith.addf %174, %176 : vector<2x64xf32>
    %c12 = arith.constant 12 : index
    %c0_32 = arith.constant 0 : index
    %178 = vector.load %arg13[%c12, %c0_32] : memref<16x64xf32, #tpu.memory_space<vmem>>, vector<2x64xf32>
    tpu.vector_store %arg13[%c12, %c0_32], %177 {strides = array<i32>} : memref<16x64xf32, #tpu.memory_space<vmem>>, vector<2x64xf32>,
    %179 = vector.extract_strided_slice %5 {offsets = [14, 0], sizes = [2, 192], strides = [1, 1]} : vector<16x192xf32> to vector<2x192xf32>
    %180 = vector.extract_strided_slice %7 {offsets = [0, 0], sizes = [2, 192], strides = [1, 1]} : vector<16x192xf32> to vector<2x192xf32>
    %181 = arith.addf %179, %180 : vector<2x192xf32>
    %cst_33 = arith.constant dense<0.000000e+00> : vector<2x192xf32>
    %182 = tpu.matmul %177, %8, %cst_33 {dimension_numbers = #tpu.dot_dimension_numbers<[1], [0], [0], [1], [0, 0, 1, 1], [], []>} : vector<2x64xf32>, vector<64x192xf32>, vector<2x192xf32> -> vector<2x192xf32>
    %183 = vector.extract_strided_slice %181 {offsets = [0, 0], sizes = [2, 128], strides = [1, 1]} : vector<2x192xf32> to vector<2x128xf32>
    %184 = vector.extract_strided_slice %182 {offsets = [0, 0], sizes = [2, 128], strides = [1, 1]} : vector<2x192xf32> to vector<2x128xf32>
    %185 = arith.addf %183, %184 : vector<2x128xf32>
    %186 = arith.negf %185 : vector<2x128xf32>
    %187 = math.exp %186 : vector<2x128xf32>
    %cst_34 = arith.constant 1.000000e+00 : f32
    %188 = vector.broadcast %cst_34 : f32 to vector<2x128xf32>
    %189 = arith.addf %188, %187 : vector<2x128xf32>
    %190 = arith.divf %188, %189 : vector<2x128xf32>
    %191 = vector.extract_strided_slice %182 {offsets = [0, 128], sizes = [2, 64], strides = [1, 1]} : vector<2x192xf32> to vector<2x64xf32>
    %192 = vector.broadcast %9 : vector<1x64xf32> to vector<2x64xf32>
    %193 = arith.addf %191, %192 : vector<2x64xf32>
    %194 = vector.extract_strided_slice %190 {offsets = [0, 0], sizes = [2, 64], strides = [1, 1]} : vector<2x128xf32> to vector<2x64xf32>
    %195 = vector.extract_strided_slice %190 {offsets = [0, 64], sizes = [2, 64], strides = [1, 1]} : vector<2x128xf32> to vector<2x64xf32>
    %196 = vector.extract_strided_slice %181 {offsets = [0, 128], sizes = [2, 64], strides = [1, 1]} : vector<2x192xf32> to vector<2x64xf32>
    %197 = arith.mulf %194, %193 : vector<2x64xf32>
    %198 = arith.addf %196, %197 : vector<2x64xf32>
    %199 = math.tanh %198 : vector<2x64xf32>
    %200 = arith.subf %177, %199 : vector<2x64xf32>
    %201 = arith.mulf %195, %200 : vector<2x64xf32>
    %202 = arith.addf %199, %201 : vector<2x64xf32>
    %c14 = arith.constant 14 : index
    %c0_35 = arith.constant 0 : index
    %203 = vector.load %arg13[%c14, %c0_35] : memref<16x64xf32, #tpu.memory_space<vmem>>, vector<2x64xf32>
    tpu.vector_store %arg13[%c14, %c0_35], %202 {strides = array<i32>} : memref<16x64xf32, #tpu.memory_space<vmem>>, vector<2x64xf32>,
    %c0_36 = arith.constant 0 : index
    %c0_37 = arith.constant 0 : index
    %204 = vector.load %arg13[%c0_36, %c0_37] : memref<16x64xf32, #tpu.memory_space<vmem>>, vector<16x64xf32>
    %c0_38 = arith.constant 0 : index
    %c0_39 = arith.constant 0 : index
    %205 = vector.load %arg7[%c0_38, %c0_39] : memref<64x192xf32, #tpu.memory_space<vmem>>, vector<64x192xf32>
    %cst_40 = arith.constant dense<0.000000e+00> : vector<16x192xf32>
    %206 = tpu.matmul %204, %205, %cst_40 {dimension_numbers = #tpu.dot_dimension_numbers<[1], [0], [0], [1], [0, 0, 1, 1], [], []>} : vector<16x64xf32>, vector<64x192xf32>, vector<16x192xf32> -> vector<16x192xf32>
    %c0_41 = arith.constant 0 : index
    %c0_42 = arith.constant 0 : index
    %207 = vector.load %arg9[%c0_41, %c0_42] : memref<1x192xf32, #tpu.memory_space<vmem>>, vector<1x192xf32>
    %208 = vector.broadcast %207 : vector<1x192xf32> to vector<16x192xf32>
    %209 = arith.addf %206, %208 : vector<16x192xf32>
    %c0_43 = arith.constant 0 : index
    %c0_44 = arith.constant 0 : index
    %210 = vector.load %arg8[%c0_43, %c0_44] : memref<64x192xf32, #tpu.memory_space<vmem>>, vector<64x192xf32>
    %cst_45 = arith.constant dense<0.000000e+00> : vector<16x192xf32>
    %211 = tpu.matmul %204, %210, %cst_45 {dimension_numbers = #tpu.dot_dimension_numbers<[1], [0], [0], [1], [0, 0, 1, 1], [], []>} : vector<16x64xf32>, vector<64x192xf32>, vector<16x192xf32> -> vector<16x192xf32>
    %c0_46 = arith.constant 0 : index
    %c0_47 = arith.constant 0 : index
    %212 = vector.load %arg10[%c0_46, %c0_47] : memref<64x192xf32, #tpu.memory_space<vmem>>, vector<64x192xf32>
    %c0_48 = arith.constant 0 : index
    %c0_49 = arith.constant 0 : index
    %213 = vector.load %arg11[%c0_48, %c0_49] : memref<1x64xf32, #tpu.memory_space<vmem>>, vector<1x64xf32>
    %214 = vector.extract_strided_slice %209 {offsets = [0, 0], sizes = [2, 192], strides = [1, 1]} : vector<16x192xf32> to vector<2x192xf32>
    %215 = vector.extract_strided_slice %211 {offsets = [14, 0], sizes = [2, 192], strides = [1, 1]} : vector<16x192xf32> to vector<2x192xf32>
    %216 = arith.addf %214, %215 : vector<2x192xf32>
    %217 = vector.extract_strided_slice %216 {offsets = [0, 0], sizes = [2, 128], strides = [1, 1]} : vector<2x192xf32> to vector<2x128xf32>
    %218 = arith.negf %217 : vector<2x128xf32>
    %219 = math.exp %218 : vector<2x128xf32>
    %cst_50 = arith.constant 1.000000e+00 : f32
    %220 = vector.broadcast %cst_50 : f32 to vector<2x128xf32>
    %221 = arith.addf %220, %219 : vector<2x128xf32>
    %222 = arith.divf %220, %221 : vector<2x128xf32>
    %223 = vector.extract_strided_slice %222 {offsets = [0, 0], sizes = [2, 64], strides = [1, 1]} : vector<2x128xf32> to vector<2x64xf32>
    %224 = vector.extract_strided_slice %222 {offsets = [0, 64], sizes = [2, 64], strides = [1, 1]} : vector<2x128xf32> to vector<2x64xf32>
    %225 = vector.extract_strided_slice %216 {offsets = [0, 128], sizes = [2, 64], strides = [1, 1]} : vector<2x192xf32> to vector<2x64xf32>
    %226 = vector.broadcast %213 : vector<1x64xf32> to vector<2x64xf32>
    %227 = arith.mulf %223, %226 : vector<2x64xf32>
    %228 = arith.addf %225, %227 : vector<2x64xf32>
    %229 = math.tanh %228 : vector<2x64xf32>
    %230 = arith.mulf %224, %229 : vector<2x64xf32>
    %231 = arith.subf %229, %230 : vector<2x64xf32>
    %232 = vector.extract_strided_slice %209 {offsets = [2, 0], sizes = [2, 192], strides = [1, 1]} : vector<16x192xf32> to vector<2x192xf32>
    %233 = vector.extract_strided_slice %211 {offsets = [12, 0], sizes = [2, 192], strides = [1, 1]} : vector<16x192xf32> to vector<2x192xf32>
    %234 = arith.addf %232, %233 : vector<2x192xf32>
    %cst_51 = arith.constant dense<0.000000e+00> : vector<2x192xf32>
    %235 = tpu.matmul %231, %212, %cst_51 {dimension_numbers = #tpu.dot_dimension_numbers<[1], [0], [0], [1], [0, 0, 1, 1], [], []>} : vector<2x64xf32>, vector<64x192xf32>, vector<2x192xf32> -> vector<2x192xf32>
    %236 = vector.extract_strided_slice %234 {offsets = [0, 0], sizes = [2, 128], strides = [1, 1]} : vector<2x192xf32> to vector<2x128xf32>
    %237 = vector.extract_strided_slice %235 {offsets = [0, 0], sizes = [2, 128], strides = [1, 1]} : vector<2x192xf32> to vector<2x128xf32>
    %238 = arith.addf %236, %237 : vector<2x128xf32>
    %239 = arith.negf %238 : vector<2x128xf32>
    %240 = math.exp %239 : vector<2x128xf32>
    %cst_52 = arith.constant 1.000000e+00 : f32
    %241 = vector.broadcast %cst_52 : f32 to vector<2x128xf32>
    %242 = arith.addf %241, %240 : vector<2x128xf32>
    %243 = arith.divf %241, %242 : vector<2x128xf32>
    %244 = vector.extract_strided_slice %235 {offsets = [0, 128], sizes = [2, 64], strides = [1, 1]} : vector<2x192xf32> to vector<2x64xf32>
    %245 = vector.broadcast %213 : vector<1x64xf32> to vector<2x64xf32>
    %246 = arith.addf %244, %245 : vector<2x64xf32>
    %247 = vector.extract_strided_slice %243 {offsets = [0, 0], sizes = [2, 64], strides = [1, 1]} : vector<2x128xf32> to vector<2x64xf32>
    %248 = vector.extract_strided_slice %243 {offsets = [0, 64], sizes = [2, 64], strides = [1, 1]} : vector<2x128xf32> to vector<2x64xf32>
    %249 = vector.extract_strided_slice %234 {offsets = [0, 128], sizes = [2, 64], strides = [1, 1]} : vector<2x192xf32> to vector<2x64xf32>
    %250 = arith.mulf %247, %246 : vector<2x64xf32>
    %251 = arith.addf %249, %250 : vector<2x64xf32>
    %252 = math.tanh %251 : vector<2x64xf32>
    %253 = arith.subf %231, %252 : vector<2x64xf32>
    %254 = arith.mulf %248, %253 : vector<2x64xf32>
    %255 = arith.addf %252, %254 : vector<2x64xf32>
    %256 = vector.extract_strided_slice %209 {offsets = [4, 0], sizes = [2, 192], strides = [1, 1]} : vector<16x192xf32> to vector<2x192xf32>
    %257 = vector.extract_strided_slice %211 {offsets = [10, 0], sizes = [2, 192], strides = [1, 1]} : vector<16x192xf32> to vector<2x192xf32>
    %258 = arith.addf %256, %257 : vector<2x192xf32>
    %cst_53 = arith.constant dense<0.000000e+00> : vector<2x192xf32>
    %259 = tpu.matmul %255, %212, %cst_53 {dimension_numbers = #tpu.dot_dimension_numbers<[1], [0], [0], [1], [0, 0, 1, 1], [], []>} : vector<2x64xf32>, vector<64x192xf32>, vector<2x192xf32> -> vector<2x192xf32>
    %260 = vector.extract_strided_slice %258 {offsets = [0, 0], sizes = [2, 128], strides = [1, 1]} : vector<2x192xf32> to vector<2x128xf32>
    %261 = vector.extract_strided_slice %259 {offsets = [0, 0], sizes = [2, 128], strides = [1, 1]} : vector<2x192xf32> to vector<2x128xf32>
    %262 = arith.addf %260, %261 : vector<2x128xf32>
    %263 = arith.negf %262 : vector<2x128xf32>
    %264 = math.exp %263 : vector<2x128xf32>
    %cst_54 = arith.constant 1.000000e+00 : f32
    %265 = vector.broadcast %cst_54 : f32 to vector<2x128xf32>
    %266 = arith.addf %265, %264 : vector<2x128xf32>
    %267 = arith.divf %265, %266 : vector<2x128xf32>
    %268 = vector.extract_strided_slice %259 {offsets = [0, 128], sizes = [2, 64], strides = [1, 1]} : vector<2x192xf32> to vector<2x64xf32>
    %269 = vector.broadcast %213 : vector<1x64xf32> to vector<2x64xf32>
    %270 = arith.addf %268, %269 : vector<2x64xf32>
    %271 = vector.extract_strided_slice %267 {offsets = [0, 0], sizes = [2, 64], strides = [1, 1]} : vector<2x128xf32> to vector<2x64xf32>
    %272 = vector.extract_strided_slice %267 {offsets = [0, 64], sizes = [2, 64], strides = [1, 1]} : vector<2x128xf32> to vector<2x64xf32>
    %273 = vector.extract_strided_slice %258 {offsets = [0, 128], sizes = [2, 64], strides = [1, 1]} : vector<2x192xf32> to vector<2x64xf32>
    %274 = arith.mulf %271, %270 : vector<2x64xf32>
    %275 = arith.addf %273, %274 : vector<2x64xf32>
    %276 = math.tanh %275 : vector<2x64xf32>
    %277 = arith.subf %255, %276 : vector<2x64xf32>
    %278 = arith.mulf %272, %277 : vector<2x64xf32>
    %279 = arith.addf %276, %278 : vector<2x64xf32>
    %280 = vector.extract_strided_slice %209 {offsets = [6, 0], sizes = [2, 192], strides = [1, 1]} : vector<16x192xf32> to vector<2x192xf32>
    %281 = vector.extract_strided_slice %211 {offsets = [8, 0], sizes = [2, 192], strides = [1, 1]} : vector<16x192xf32> to vector<2x192xf32>
    %282 = arith.addf %280, %281 : vector<2x192xf32>
    %cst_55 = arith.constant dense<0.000000e+00> : vector<2x192xf32>
    %283 = tpu.matmul %279, %212, %cst_55 {dimension_numbers = #tpu.dot_dimension_numbers<[1], [0], [0], [1], [0, 0, 1, 1], [], []>} : vector<2x64xf32>, vector<64x192xf32>, vector<2x192xf32> -> vector<2x192xf32>
    %284 = vector.extract_strided_slice %282 {offsets = [0, 0], sizes = [2, 128], strides = [1, 1]} : vector<2x192xf32> to vector<2x128xf32>
    %285 = vector.extract_strided_slice %283 {offsets = [0, 0], sizes = [2, 128], strides = [1, 1]} : vector<2x192xf32> to vector<2x128xf32>
    %286 = arith.addf %284, %285 : vector<2x128xf32>
    %287 = arith.negf %286 : vector<2x128xf32>
    %288 = math.exp %287 : vector<2x128xf32>
    %cst_56 = arith.constant 1.000000e+00 : f32
    %289 = vector.broadcast %cst_56 : f32 to vector<2x128xf32>
    %290 = arith.addf %289, %288 : vector<2x128xf32>
    %291 = arith.divf %289, %290 : vector<2x128xf32>
    %292 = vector.extract_strided_slice %283 {offsets = [0, 128], sizes = [2, 64], strides = [1, 1]} : vector<2x192xf32> to vector<2x64xf32>
    %293 = vector.broadcast %213 : vector<1x64xf32> to vector<2x64xf32>
    %294 = arith.addf %292, %293 : vector<2x64xf32>
    %295 = vector.extract_strided_slice %291 {offsets = [0, 0], sizes = [2, 64], strides = [1, 1]} : vector<2x128xf32> to vector<2x64xf32>
    %296 = vector.extract_strided_slice %291 {offsets = [0, 64], sizes = [2, 64], strides = [1, 1]} : vector<2x128xf32> to vector<2x64xf32>
    %297 = vector.extract_strided_slice %282 {offsets = [0, 128], sizes = [2, 64], strides = [1, 1]} : vector<2x192xf32> to vector<2x64xf32>
    %298 = arith.mulf %295, %294 : vector<2x64xf32>
    %299 = arith.addf %297, %298 : vector<2x64xf32>
    %300 = math.tanh %299 : vector<2x64xf32>
    %301 = arith.subf %279, %300 : vector<2x64xf32>
    %302 = arith.mulf %296, %301 : vector<2x64xf32>
    %303 = arith.addf %300, %302 : vector<2x64xf32>
    %304 = vector.extract_strided_slice %209 {offsets = [8, 0], sizes = [2, 192], strides = [1, 1]} : vector<16x192xf32> to vector<2x192xf32>
    %305 = vector.extract_strided_slice %211 {offsets = [6, 0], sizes = [2, 192], strides = [1, 1]} : vector<16x192xf32> to vector<2x192xf32>
    %306 = arith.addf %304, %305 : vector<2x192xf32>
    %cst_57 = arith.constant dense<0.000000e+00> : vector<2x192xf32>
    %307 = tpu.matmul %303, %212, %cst_57 {dimension_numbers = #tpu.dot_dimension_numbers<[1], [0], [0], [1], [0, 0, 1, 1], [], []>} : vector<2x64xf32>, vector<64x192xf32>, vector<2x192xf32> -> vector<2x192xf32>
    %308 = vector.extract_strided_slice %306 {offsets = [0, 0], sizes = [2, 128], strides = [1, 1]} : vector<2x192xf32> to vector<2x128xf32>
    %309 = vector.extract_strided_slice %307 {offsets = [0, 0], sizes = [2, 128], strides = [1, 1]} : vector<2x192xf32> to vector<2x128xf32>
    %310 = arith.addf %308, %309 : vector<2x128xf32>
    %311 = arith.negf %310 : vector<2x128xf32>
    %312 = math.exp %311 : vector<2x128xf32>
    %cst_58 = arith.constant 1.000000e+00 : f32
    %313 = vector.broadcast %cst_58 : f32 to vector<2x128xf32>
    %314 = arith.addf %313, %312 : vector<2x128xf32>
    %315 = arith.divf %313, %314 : vector<2x128xf32>
    %316 = vector.extract_strided_slice %307 {offsets = [0, 128], sizes = [2, 64], strides = [1, 1]} : vector<2x192xf32> to vector<2x64xf32>
    %317 = vector.broadcast %213 : vector<1x64xf32> to vector<2x64xf32>
    %318 = arith.addf %316, %317 : vector<2x64xf32>
    %319 = vector.extract_strided_slice %315 {offsets = [0, 0], sizes = [2, 64], strides = [1, 1]} : vector<2x128xf32> to vector<2x64xf32>
    %320 = vector.extract_strided_slice %315 {offsets = [0, 64], sizes = [2, 64], strides = [1, 1]} : vector<2x128xf32> to vector<2x64xf32>
    %321 = vector.extract_strided_slice %306 {offsets = [0, 128], sizes = [2, 64], strides = [1, 1]} : vector<2x192xf32> to vector<2x64xf32>
    %322 = arith.mulf %319, %318 : vector<2x64xf32>
    %323 = arith.addf %321, %322 : vector<2x64xf32>
    %324 = math.tanh %323 : vector<2x64xf32>
    %325 = arith.subf %303, %324 : vector<2x64xf32>
    %326 = arith.mulf %320, %325 : vector<2x64xf32>
    %327 = arith.addf %324, %326 : vector<2x64xf32>
    %328 = vector.extract_strided_slice %209 {offsets = [10, 0], sizes = [2, 192], strides = [1, 1]} : vector<16x192xf32> to vector<2x192xf32>
    %329 = vector.extract_strided_slice %211 {offsets = [4, 0], sizes = [2, 192], strides = [1, 1]} : vector<16x192xf32> to vector<2x192xf32>
    %330 = arith.addf %328, %329 : vector<2x192xf32>
    %cst_59 = arith.constant dense<0.000000e+00> : vector<2x192xf32>
    %331 = tpu.matmul %327, %212, %cst_59 {dimension_numbers = #tpu.dot_dimension_numbers<[1], [0], [0], [1], [0, 0, 1, 1], [], []>} : vector<2x64xf32>, vector<64x192xf32>, vector<2x192xf32> -> vector<2x192xf32>
    %332 = vector.extract_strided_slice %330 {offsets = [0, 0], sizes = [2, 128], strides = [1, 1]} : vector<2x192xf32> to vector<2x128xf32>
    %333 = vector.extract_strided_slice %331 {offsets = [0, 0], sizes = [2, 128], strides = [1, 1]} : vector<2x192xf32> to vector<2x128xf32>
    %334 = arith.addf %332, %333 : vector<2x128xf32>
    %335 = arith.negf %334 : vector<2x128xf32>
    %336 = math.exp %335 : vector<2x128xf32>
    %cst_60 = arith.constant 1.000000e+00 : f32
    %337 = vector.broadcast %cst_60 : f32 to vector<2x128xf32>
    %338 = arith.addf %337, %336 : vector<2x128xf32>
    %339 = arith.divf %337, %338 : vector<2x128xf32>
    %340 = vector.extract_strided_slice %331 {offsets = [0, 128], sizes = [2, 64], strides = [1, 1]} : vector<2x192xf32> to vector<2x64xf32>
    %341 = vector.broadcast %213 : vector<1x64xf32> to vector<2x64xf32>
    %342 = arith.addf %340, %341 : vector<2x64xf32>
    %343 = vector.extract_strided_slice %339 {offsets = [0, 0], sizes = [2, 64], strides = [1, 1]} : vector<2x128xf32> to vector<2x64xf32>
    %344 = vector.extract_strided_slice %339 {offsets = [0, 64], sizes = [2, 64], strides = [1, 1]} : vector<2x128xf32> to vector<2x64xf32>
    %345 = vector.extract_strided_slice %330 {offsets = [0, 128], sizes = [2, 64], strides = [1, 1]} : vector<2x192xf32> to vector<2x64xf32>
    %346 = arith.mulf %343, %342 : vector<2x64xf32>
    %347 = arith.addf %345, %346 : vector<2x64xf32>
    %348 = math.tanh %347 : vector<2x64xf32>
    %349 = arith.subf %327, %348 : vector<2x64xf32>
    %350 = arith.mulf %344, %349 : vector<2x64xf32>
    %351 = arith.addf %348, %350 : vector<2x64xf32>
    %352 = vector.extract_strided_slice %209 {offsets = [12, 0], sizes = [2, 192], strides = [1, 1]} : vector<16x192xf32> to vector<2x192xf32>
    %353 = vector.extract_strided_slice %211 {offsets = [2, 0], sizes = [2, 192], strides = [1, 1]} : vector<16x192xf32> to vector<2x192xf32>
    %354 = arith.addf %352, %353 : vector<2x192xf32>
    %cst_61 = arith.constant dense<0.000000e+00> : vector<2x192xf32>
    %355 = tpu.matmul %351, %212, %cst_61 {dimension_numbers = #tpu.dot_dimension_numbers<[1], [0], [0], [1], [0, 0, 1, 1], [], []>} : vector<2x64xf32>, vector<64x192xf32>, vector<2x192xf32> -> vector<2x192xf32>
    %356 = vector.extract_strided_slice %354 {offsets = [0, 0], sizes = [2, 128], strides = [1, 1]} : vector<2x192xf32> to vector<2x128xf32>
    %357 = vector.extract_strided_slice %355 {offsets = [0, 0], sizes = [2, 128], strides = [1, 1]} : vector<2x192xf32> to vector<2x128xf32>
    %358 = arith.addf %356, %357 : vector<2x128xf32>
    %359 = arith.negf %358 : vector<2x128xf32>
    %360 = math.exp %359 : vector<2x128xf32>
    %cst_62 = arith.constant 1.000000e+00 : f32
    %361 = vector.broadcast %cst_62 : f32 to vector<2x128xf32>
    %362 = arith.addf %361, %360 : vector<2x128xf32>
    %363 = arith.divf %361, %362 : vector<2x128xf32>
    %364 = vector.extract_strided_slice %355 {offsets = [0, 128], sizes = [2, 64], strides = [1, 1]} : vector<2x192xf32> to vector<2x64xf32>
    %365 = vector.broadcast %213 : vector<1x64xf32> to vector<2x64xf32>
    %366 = arith.addf %364, %365 : vector<2x64xf32>
    %367 = vector.extract_strided_slice %363 {offsets = [0, 0], sizes = [2, 64], strides = [1, 1]} : vector<2x128xf32> to vector<2x64xf32>
    %368 = vector.extract_strided_slice %363 {offsets = [0, 64], sizes = [2, 64], strides = [1, 1]} : vector<2x128xf32> to vector<2x64xf32>
    %369 = vector.extract_strided_slice %354 {offsets = [0, 128], sizes = [2, 64], strides = [1, 1]} : vector<2x192xf32> to vector<2x64xf32>
    %370 = arith.mulf %367, %366 : vector<2x64xf32>
    %371 = arith.addf %369, %370 : vector<2x64xf32>
    %372 = math.tanh %371 : vector<2x64xf32>
    %373 = arith.subf %351, %372 : vector<2x64xf32>
    %374 = arith.mulf %368, %373 : vector<2x64xf32>
    %375 = arith.addf %372, %374 : vector<2x64xf32>
    %376 = vector.extract_strided_slice %209 {offsets = [14, 0], sizes = [2, 192], strides = [1, 1]} : vector<16x192xf32> to vector<2x192xf32>
    %377 = vector.extract_strided_slice %211 {offsets = [0, 0], sizes = [2, 192], strides = [1, 1]} : vector<16x192xf32> to vector<2x192xf32>
    %378 = arith.addf %376, %377 : vector<2x192xf32>
    %cst_63 = arith.constant dense<0.000000e+00> : vector<2x192xf32>
    %379 = tpu.matmul %375, %212, %cst_63 {dimension_numbers = #tpu.dot_dimension_numbers<[1], [0], [0], [1], [0, 0, 1, 1], [], []>} : vector<2x64xf32>, vector<64x192xf32>, vector<2x192xf32> -> vector<2x192xf32>
    %380 = vector.extract_strided_slice %378 {offsets = [0, 0], sizes = [2, 128], strides = [1, 1]} : vector<2x192xf32> to vector<2x128xf32>
    %381 = vector.extract_strided_slice %379 {offsets = [0, 0], sizes = [2, 128], strides = [1, 1]} : vector<2x192xf32> to vector<2x128xf32>
    %382 = arith.addf %380, %381 : vector<2x128xf32>
    %383 = arith.negf %382 : vector<2x128xf32>
    %384 = math.exp %383 : vector<2x128xf32>
    %cst_64 = arith.constant 1.000000e+00 : f32
    %385 = vector.broadcast %cst_64 : f32 to vector<2x128xf32>
    %386 = arith.addf %385, %384 : vector<2x128xf32>
    %387 = arith.divf %385, %386 : vector<2x128xf32>
    %388 = vector.extract_strided_slice %379 {offsets = [0, 128], sizes = [2, 64], strides = [1, 1]} : vector<2x192xf32> to vector<2x64xf32>
    %389 = vector.broadcast %213 : vector<1x64xf32> to vector<2x64xf32>
    %390 = arith.addf %388, %389 : vector<2x64xf32>
    %391 = vector.extract_strided_slice %387 {offsets = [0, 0], sizes = [2, 64], strides = [1, 1]} : vector<2x128xf32> to vector<2x64xf32>
    %392 = vector.extract_strided_slice %387 {offsets = [0, 64], sizes = [2, 64], strides = [1, 1]} : vector<2x128xf32> to vector<2x64xf32>
    %393 = vector.extract_strided_slice %378 {offsets = [0, 128], sizes = [2, 64], strides = [1, 1]} : vector<2x192xf32> to vector<2x64xf32>
    %394 = arith.mulf %391, %390 : vector<2x64xf32>
    %395 = arith.addf %393, %394 : vector<2x64xf32>
    %396 = math.tanh %395 : vector<2x64xf32>
    %397 = arith.subf %375, %396 : vector<2x64xf32>
    %398 = arith.mulf %392, %397 : vector<2x64xf32>
    %399 = arith.addf %396, %398 : vector<2x64xf32>
    %400 = tpu.concatenate %202, %399 in 1 : vector<2x64xf32>, vector<2x64xf32> -> vector<2x128xf32>
    %c0_65 = arith.constant 0 : index
    %c0_66 = arith.constant 0 : index
    %401 = vector.load %arg12[%c0_65, %c0_66] : memref<2x128xf32, #tpu.memory_space<vmem>>, vector<2x128xf32>
    tpu.vector_store %arg12[%c0_65, %c0_66], %400 {strides = array<i32>} : memref<2x128xf32, #tpu.memory_space<vmem>>, vector<2x128xf32>,
    return
  }
  func.func @transform_0(%arg0: i32) -> (i32, i32) {
    %c0_i32 = arith.constant 0 : i32
    %c0_i32_0 = arith.constant 0 : i32
    return %arg0, %c0_i32 : i32, i32
  }
  func.func @transform_1(%arg0: i32) -> (i32, i32) {
    %c0_i32 = arith.constant 0 : i32
    %c0_i32_0 = arith.constant 0 : i32
    %c0_i32_1 = arith.constant 0 : i32
    return %c0_i32, %c0_i32_0 : i32, i32
  }
  func.func @transform_2(%arg0: i32) -> (i32, i32) {
    %c0_i32 = arith.constant 0 : i32
    %c0_i32_0 = arith.constant 0 : i32
    %c0_i32_1 = arith.constant 0 : i32
    return %c0_i32, %c0_i32_0 : i32, i32
  }
  func.func @transform_3(%arg0: i32) -> (i32, i32) {
    %c0_i32 = arith.constant 0 : i32
    %c0_i32_0 = arith.constant 0 : i32
    %c0_i32_1 = arith.constant 0 : i32
    return %c0_i32, %c0_i32_0 : i32, i32
  }
  func.func @transform_4(%arg0: i32) -> (i32, i32) {
    %c0_i32 = arith.constant 0 : i32
    %c0_i32_0 = arith.constant 0 : i32
    %c0_i32_1 = arith.constant 0 : i32
    return %c0_i32, %c0_i32_0 : i32, i32
  }
  func.func @transform_5(%arg0: i32) -> (i32, i32) {
    %c0_i32 = arith.constant 0 : i32
    %c0_i32_0 = arith.constant 0 : i32
    %c0_i32_1 = arith.constant 0 : i32
    return %c0_i32, %c0_i32_0 : i32, i32
  }
  func.func @transform_6(%arg0: i32) -> (i32, i32) {
    %c0_i32 = arith.constant 0 : i32
    %c0_i32_0 = arith.constant 0 : i32
    %c0_i32_1 = arith.constant 0 : i32
    return %c0_i32, %c0_i32_0 : i32, i32
  }
  func.func @transform_7(%arg0: i32) -> (i32, i32) {
    %c0_i32 = arith.constant 0 : i32
    %c0_i32_0 = arith.constant 0 : i32
    %c0_i32_1 = arith.constant 0 : i32
    return %c0_i32, %c0_i32_0 : i32, i32
  }
  func.func @transform_8(%arg0: i32) -> (i32, i32) {
    %c0_i32 = arith.constant 0 : i32
    %c0_i32_0 = arith.constant 0 : i32
    %c0_i32_1 = arith.constant 0 : i32
    return %c0_i32, %c0_i32_0 : i32, i32
  }
  func.func @transform_9(%arg0: i32) -> (i32, i32) {
    %c0_i32 = arith.constant 0 : i32
    %c0_i32_0 = arith.constant 0 : i32
    %c0_i32_1 = arith.constant 0 : i32
    return %c0_i32, %c0_i32_0 : i32, i32
  }
  func.func @transform_10(%arg0: i32) -> (i32, i32) {
    %c0_i32 = arith.constant 0 : i32
    %c0_i32_0 = arith.constant 0 : i32
    %c0_i32_1 = arith.constant 0 : i32
    return %c0_i32, %c0_i32_0 : i32, i32
  }
  func.func @transform_11(%arg0: i32) -> (i32, i32) {
    %c0_i32 = arith.constant 0 : i32
    %c0_i32_0 = arith.constant 0 : i32
    return %arg0, %c0_i32 : i32, i32
  }
}

</mosaic_0001>

<bundles_post_ra>
// kernel: encoder_forward.1
= control target key start
LH: loop header
LB: loop body
LE: loop exit
PB: predicated region body
PF: predicated region fallthrough
CT: control target
= control target key end

     0   :  { %16 = vsyncpa [#allocation4], 0  ;;  %s3358_s0 = inlined_call_operand.vmem [shape: f32[16,12], index: 0, kind: input, shape index: {}]   ;;  %s3359_s1 = inlined_call_operand.vmem [shape: f32[12,192], index: 1, kind: input, shape index: {}]   ;;  %s3360_s2 = inlined_call_operand.vmem [shape: f32[12,192], index: 2, kind: input, shape index: {}]   ;;  %s3361_s3 = inlined_call_operand.vmem [shape: f32[1,192], index: 3, kind: input, shape index: {}]   ;;  %s3362_s4 = inlined_call_operand.hbm [shape: f32[64,192], index: 4, kind: input, shape index: {}]   ;;  %s3363_s5 = inlined_call_operand.hbm [shape: f32[1,64], index: 5, kind: input, shape index: {}]   ;;  %s3364_s6 = inlined_call_operand.hbm [shape: f32[64,192], index: 6, kind: input, shape index: {}]   ;;  %s3365_s7 = inlined_call_operand.hbm [shape: f32[64,192], index: 7, kind: input, shape index: {}]   ;;  %s3366_s8 = inlined_call_operand.hbm [shape: f32[1,192], index: 8, kind: input, shape index: {}]   ;;  %s3367_s9 = inlined_call_operand.hbm [shape: f32[64,192], index: 9, kind: input, shape index: {}]   ;;  %s3368_s10 = inlined_call_operand.hbm [shape: f32[1,64], index: 10, kind: input, shape index: {}]   ;;  %s3369_s11 = inlined_call_operand.hbm [shape: f32[2,128], index: 11, kind: output, shape index: {}]  }
   0x1   :  { %17 = vsyncpa [#allocation7], 0 }
   0x2   :  { %18 = vsyncpa [#allocation10], 0 }
   0x3   :  { %19 = vsyncpa [#allocation13], 0 }
   0x4   :  { %20 = vsyncpa [#allocation5], 0  ;;  %s2796_s17 = smov [#allocation6]   ;;  %s2610_s21 = scalar_lea.hbm %s3363_s5, 16 }
   0x5   :  { %s47_s18 = sshll.u32 %s2796_s17, 4  ;;  %p2611_p0 = scmp.ne.s32.totalorder %s3363_s5, %s2610_s21  ;;  %s48_s18 = int_to_ptr.vmem [resolvable:$true] %s47_s18 }
   0x6   :  { %p2614_p1 = scmp.lt.u32.totalorder %s2610_s21, %s3363_s5 }
   0x8   :  { %p2616_p2 = pnand %p2614_p1, %p2611_p0 }
   0xa   :  { %2619 = shalt.err (!%p2616_p2)
}
   0xb   :  { %s2620_s26 = scalar_lea.vmem %s48_s18, 16  ;;  %s2624_s27 = scalar_lea.vmem %s48_s18, 32 }
   0xc   :  { %p2621_p3 = scmp.ne.s32.totalorder %s48_s18, %s2620_s26  ;;  %p2625_p4 = scmp.lt.s32.totalorder %s48_s18, %s48_s18 }
   0xd   :  { %p2626_p5 = scmp.lt.s32.totalorder %s2624_s27, %s2620_s26 }
   0xf   :  { %p2627_p6 = por %p2626_p5, %p2625_p4 }
  0x11   :  { %p2628_p7 = pnand %p2627_p6, %p2621_p3 }
  0x13   :  { %2631 = shalt.err (!%p2628_p7)
}
  0x14   :  { %50 = dma.hbm_to_vmem [thread:$0]  %s3363_s5, 16, %s48_s18, [#allocation7]  }
  0x15   :  { %s2797_s30 = smov [#allocation9]   ;;  %s2798_s13 = smov [#allocation12]  }
  0x16   :  { %s68_s12 = sshll.u32 %s2797_s30, 4  ;;  %s90_s14 = sshll.u32 %s2798_s13, 4  ;;  %s69_s12 = int_to_ptr.vmem [resolvable:$true] %s68_s12  ;;  %s91_s14 = int_to_ptr.vmem [resolvable:$true] %s90_s14 }
  0x17   :  { %s2632_s17 = scalar_lea.hbm %s3365_s7, 2048 }
  0x18   :  { %p2633_p8 = scmp.ne.s32.totalorder %s3365_s7, %s2632_s17  ;;  %p2636_p9 = scmp.lt.u32.totalorder %s2632_s17, %s3365_s7 }
  0x1a   :  { %p2638_p10 = pnand %p2636_p9, %p2633_p8 }
  0x1c   :  { %2641 = shalt.err (!%p2638_p10)
}
  0x1d   :  { %s2642_s5 = scalar_lea.vmem %s69_s12, 2048  ;;  %p2647_p12 = scmp.lt.s32.totalorder %s69_s12, %s69_s12 }
  0x1e   :  { %p2643_p11 = scmp.ne.s32.totalorder %s69_s12, %s2642_s5  ;;  %p2648_p13 = scmp.lt.s32.totalorder %s2642_s5, %s2642_s5 }
  0x20   :  { %p2649_p0 = por %p2648_p13, %p2647_p12 }
  0x22   :  { %p2650_p1 = pnand %p2649_p0, %p2643_p11 }
  0x24   :  { %2653 = shalt.err (!%p2650_p1)
}
  0x25   :  { %s2799_s18 = smov 256   ;;  %s2800_s23 = smov 16  }
  0x26   :  { %74 = dma.hbm_to_vmem [thread:$0]  %s3365_s7, 2048, %s69_s12, [#allocation10], %s2799_s18, %s2799_s18, %s2800_s23  }
  0x27   :  { %s2654_s28 = scalar_lea.hbm %s3367_s9, 2048 }
  0x28   :  { %p2655_p2 = scmp.ne.s32.totalorder %s3367_s9, %s2654_s28  ;;  %p2658_p3 = scmp.lt.u32.totalorder %s2654_s28, %s3367_s9 }
  0x2a   :  { %p2660_p4 = pnand %p2658_p3, %p2655_p2 }
  0x2c   :  { %2663 = shalt.err (!%p2660_p4)
}
  0x2d   :  { %s2664_s16 = scalar_lea.vmem %s91_s14, 2048  ;;  %p2669_p6 = scmp.lt.s32.totalorder %s91_s14, %s91_s14 }
  0x2e   :  { %p2665_p5 = scmp.ne.s32.totalorder %s91_s14, %s2664_s16  ;;  %p2670_p7 = scmp.lt.s32.totalorder %s2664_s16, %s2664_s16 }
  0x30   :  { %p2671_p8 = por %p2670_p7, %p2669_p6 }
  0x32   :  { %p2672_p9 = pnand %p2671_p8, %p2665_p5 }
  0x34   :  { %2675 = shalt.err (!%p2672_p9)
}
  0x35   :  { %96 = dma.hbm_to_vmem [thread:$0]  %s3367_s9, 2048, %s91_s14, [#allocation13], %s2799_s18, %s2799_s18, %s2800_s23  }
  0x36   :  { %s2801_s17 = smov [#allocation3]   ;;  %s2802_s20 = smov [#allocation8]  }
  0x37   :  { %s34_s19 = sshll.u32 %s2801_s17, 4  ;;  %s56_s21 = sshll.u32 %s2802_s20, 4  ;;  %s35_s19 = int_to_ptr.vmem [resolvable:$true] %s34_s19  ;;  %s57_s21 = int_to_ptr.vmem [resolvable:$true] %s56_s21 }
  0x38   :  { %s2676_s24 = scalar_lea.hbm %s3362_s4, 2048 }
  0x39   :  { %p2677_p10 = scmp.ne.s32.totalorder %s3362_s4, %s2676_s24  ;;  %p2680_p11 = scmp.lt.u32.totalorder %s2676_s24, %s3362_s4 }
  0x3b   :  { %p2682_p12 = pnand %p2680_p11, %p2677_p10 }
  0x3d   :  { %2685 = shalt.err (!%p2682_p12)
}
  0x3e   :  { %s2686_s9 = scalar_lea.vmem %s35_s19, 2048  ;;  %p2691_p0 = scmp.lt.s32.totalorder %s35_s19, %s35_s19 }
  0x3f   :  { %p2687_p13 = scmp.ne.s32.totalorder %s35_s19, %s2686_s9  ;;  %p2692_p1 = scmp.lt.s32.totalorder %s2686_s9, %s2686_s9 }
  0x41   :  { %p2693_p2 = por %p2692_p1, %p2691_p0 }
  0x43   :  { %p2694_p3 = pnand %p2693_p2, %p2687_p13 }
  0x45   :  { %2697 = shalt.err (!%p2694_p3)
}
  0x46   :  { %40 = dma.hbm_to_vmem [thread:$0]  %s3362_s4, 2048, %s35_s19, [#allocation4], %s2799_s18, %s2799_s18, %s2800_s23  }
  0x47   :  { %s2698_s15 = scalar_lea.hbm %s3364_s6, 2048 }
  0x48   :  { %p2699_p4 = scmp.ne.s32.totalorder %s3364_s6, %s2698_s15  ;;  %p2702_p5 = scmp.lt.u32.totalorder %s2698_s15, %s3364_s6 }
  0x4a   :  { %p2704_p6 = pnand %p2702_p5, %p2699_p4 }
  0x4c   :  { %2707 = shalt.err (!%p2704_p6)
}
  0x4d   :  { %s2708_s20 = scalar_lea.vmem %s57_s21, 2048  ;;  %p2713_p8 = scmp.lt.s32.totalorder %s57_s21, %s57_s21 }
  0x4e   :  { %p2709_p7 = scmp.ne.s32.totalorder %s57_s21, %s2708_s20  ;;  %p2714_p9 = scmp.lt.s32.totalorder %s2708_s20, %s2708_s20 }
  0x50   :  { %p2715_p10 = por %p2714_p9, %p2713_p8 }
  0x52   :  { %p2716_p11 = pnand %p2715_p10, %p2709_p7 }
  0x54   :  { %2719 = shalt.err (!%p2716_p11)
}
  0x55   :  { %62 = dma.hbm_to_vmem [thread:$0]  %s3364_s6, 2048, %s57_s21, [#allocation7], %s2799_s18, %s2799_s18, %s2800_s23  }
  0x56   :  { %s2803_s22 = smov [#allocation11]   ;;  %s2804_s24 = smov [#allocation14]  }
  0x57   :  { %s81_s5 = sshll.u32 %s2803_s22, 4  ;;  %s103_s25 = sshll.u32 %s2804_s24, 4  ;;  %s82_s5 = int_to_ptr.vmem [resolvable:$true] %s81_s5  ;;  %s104_s25 = int_to_ptr.vmem [resolvable:$true] %s103_s25 }
  0x58   :  { %s2720_s28 = scalar_lea.hbm %s3366_s8, 32 }
  0x59   :  { %p2721_p12 = scmp.ne.s32.totalorder %s3366_s8, %s2720_s28  ;;  %p2724_p13 = scmp.lt.u32.totalorder %s2720_s28, %s3366_s8 }
  0x5b   :  { %p2726_p0 = pnand %p2724_p13, %p2721_p12 }
  0x5d   :  { %2729 = shalt.err (!%p2726_p0)
}
  0x5e   :  { %s2730_s6 = scalar_lea.vmem %s82_s5, 32  ;;  %p2735_p2 = scmp.lt.s32.totalorder %s82_s5, %s82_s5 }
  0x5f   :  { %p2731_p1 = scmp.ne.s32.totalorder %s82_s5, %s2730_s6  ;;  %p2736_p3 = scmp.lt.s32.totalorder %s2730_s6, %s2730_s6 }
  0x61   :  { %p2737_p4 = por %p2736_p3, %p2735_p2 }
  0x63   :  { %p2738_p5 = pnand %p2737_p4, %p2731_p1 }
  0x65   :  { %2741 = shalt.err (!%p2738_p5)
}
  0x66   :  { %84 = dma.hbm_to_vmem [thread:$0]  %s3366_s8, 32, %s82_s5, [#allocation10]  }
  0x67   :  { %s2742_s15 = scalar_lea.hbm %s3368_s10, 16 }
  0x68   :  { %p2743_p6 = scmp.ne.s32.totalorder %s3368_s10, %s2742_s15  ;;  %p2746_p7 = scmp.lt.u32.totalorder %s2742_s15, %s3368_s10 }
  0x6a   :  { %p2748_p8 = pnand %p2746_p7, %p2743_p6 }
  0x6c   :  { %2751 = shalt.err (!%p2748_p8)
}
  0x6d   :  { %s2752_s20 = scalar_lea.vmem %s104_s25, 16  ;;  %s2756_s4 = scalar_lea.vmem %s104_s25, 32 }
  0x6e   :  { %p2753_p9 = scmp.ne.s32.totalorder %s104_s25, %s2752_s20  ;;  %p2757_p10 = scmp.lt.s32.totalorder %s104_s25, %s104_s25 }
  0x6f   :  { %p2758_p11 = scmp.lt.s32.totalorder %s2756_s4, %s2752_s20 }
  0x71   :  { %p2759_p12 = por %p2758_p11, %p2757_p10 }
  0x73   :  { %p2760_p13 = pnand %p2759_p12, %p2753_p9 }
  0x75   :  { %2763 = shalt.err (!%p2760_p13)
}
  0x76   :  { %106 = dma.hbm_to_vmem [thread:$0]  %s3368_s10, 16, %s104_s25, [#allocation13]  }
  0x77   :  { %2786 = dma.done.wait [#allocation4], 2048  }
  0x78   :  { %2787 = vsyncadd [#allocation4], 4294965248 }
  0x79   :  { %2788 = dma.done.wait [#allocation7], 2064  }
  0x7a   :  { %2789 = vsyncadd [#allocation7], 4294965232 }
  0x7b   :  { %2790 = dma.done.wait [#allocation10], 2080  }
  0x7c   :  { %2791 = vsyncadd [#allocation10], 4294965216 }
  0x7d   :  { %2792 = dma.done.wait [#allocation13], 2064  }
  0x7e   :  { %2793 = vsyncadd [#allocation13], 4294965232  ;;  %v2805_v0 = vmov 0.0   ;;  %vm153_vm0 = vcmask 1043456   ;;  %vm2806_vm1 = vmmov 1   ;;  %v131_v2 = vld [vmem:[%s3359_s1 + $0x8] sm:$0xff]  ;;  %v136_v16 = vlaneseq }
  0x7f   :  { %224 = vmatprep.mubr.f32.mxu0 %v2805_v0  ;;  %311 = vmatprep.mubr.f32.mxu1 %v2805_v0  ;;  %vm2967_vm2 = vmpackc.low %vm153_vm0, %vm2806_vm1  ;;  %v133_v3 = vld [vmem:[%s3359_s1 + $0x18] sm:$0xf]  ;;  %v238_v4 = vld [vmem:[%s3360_s2 + $0x8] sm:$0xff]  ;;  %vm146_vm3 = vcmask 97280   ;;  %vm374_vm4 = vcmask 517120   ;;  %vm382_vm5 = vcmask 523264  }
  0x80   :  { %v2233_v5 = vpack.c.bf16 %v133_v3, %v131_v2  ;;  %v240_v6 = vld [vmem:[%s3360_s2 + $0x18] sm:$0xf]  ;;  %v130_v7 = vld [vmem:[%s3359_s1] sm:$0xff]  ;;  %v132_v8 = vld [vmem:[%s3359_s1 + $0x10] sm:$0xf]  ;;  %v3013_v17 = vshrl.u32 %v136_v16, 7 }
  0x81   :  { %v2239_v9 = vpack.c.bf16 %v240_v6, %v238_v4  ;;  %v2236_v10 = vpack.c.bf16 %v132_v8, %v130_v7  ;;  %v237_v11 = vld [vmem:[%s3360_s2] sm:$0xff]  ;;  %v239_v12 = vld [vmem:[%s3360_s2 + $0x10] sm:$0xf]  ;;  %v129_v15 = vld [vmem:[%s3358_s0 + $0x8] sm:$0xff]  ;;  %vm489_vm6 = vcmask 519170   ;;  %vm598_vm7 = vcmask 521220  }
  0x82   :  { %2235 = vmatprep.subr.msk.bf16.mxu0 %vm2967_vm2, %v2233_v5  ;;  %v2242_v13 = vpack.c.bf16 %v239_v12, %v237_v11  ;;  %v128_v14 = vld [vmem:[%s3358_s0] sm:$0xff]  ;;  %v138_v18 = vsub.s32 0, %v3013_v17  ;;  %v142_v20 = vsub.s32 1, %v3013_v17  ;;  %v3041_v54 = vld [vmem:[#allocation6] ss:$0 sm:$0xff]  ;;  %v325_v58 = vld [vmem:[#allocation3 + $0x8] sm:$0xff] }
  0x83   :  { %2241 = vmatprep.subr.msk.bf16.mxu1 %vm2967_vm2, %v2239_v9  ;;  %2238 = vmatpush1.bf16.msk.msra.mxu0 %vm2967_vm2, %v2236_v10  ;;  %v134_v19 = vld [vmem:[%s3361_s3] sm:$0x3]  ;;  %v327_v59 = vld [vmem:[#allocation3 + $0x18] sm:$0xff]  ;;  %v324_v60 = vld [vmem:[#allocation3] sm:$0xff]  ;;  %s2807_s0 = smov 64   ;;  %vm707_vm8 = vcmask 523270  }
  0x84   :  { %2244 = vmatpush1.bf16.msk.msra.mxu1 %vm2967_vm2, %v2242_v13  ;;  %v139_v21 = vrot.slane %v134_v19, %v138_v18  ;;  %v143_v24 = vrot.slane %v134_v19, %v142_v20  ;;  %v3045_v61 = vpack.c.bf16 %v327_v59, %v325_v58  ;;  %v326_v62 = vld [vmem:[#allocation3 + $0x10] sm:$0xff]  ;;  %v329_v63 = vld [vmem:[#allocation3 + $0x28] sm:$0xff]  ;;  %v331_v1 = vld [vmem:[#allocation3 + $0x38] sm:$0xff]  ;;  %s2808_s3 = smov [#allocation15]  }
  0x85   :  { %v3047_v2 = vpack.c.bf16 %v326_v62, %v324_v60  ;;  %v3049_v3 = vpack.c.bf16 %v331_v1, %v329_v63  ;;  %v328_v4 = vld [vmem:[#allocation3 + $0x20] sm:$0xff]  ;;  %v330_v5 = vld [vmem:[#allocation3 + $0x30] sm:$0xff]  ;;  %v333_v6 = vld [vmem:[#allocation3 + $0x48] sm:$0xff]  ;;  %s2177_s12 = sshll.u32 %s2808_s3, 4  ;;  %s2178_s12 = int_to_ptr.vmem [resolvable:$true] %s2177_s12 }
  0x86   :  { %2191 = vmatmul.mubr.msk.f32.vlgmr.msra.gmra.mrb[0].mxu0 %vm146_vm3, %v128_v14  ;;  %2246 = vmatprep.subr.bf16.mxu0 %v3045_v61  ;;  %v335_v7 = vld [vmem:[#allocation3 + $0x58] sm:$0xff]  ;;  %v3054_v8 = vpack.c.bf16 %v330_v5, %v328_v4  ;;  %v332_v10 = vld [vmem:[#allocation3 + $0x40] sm:$0xff]  ;;  %v334_v11 = vld [vmem:[#allocation3 + $0x50] sm:$0xff]  ;;  %s2764_s17 = scalar_lea.vmem %s2178_s12, 32  ;;  %p2769_p1 = scmp.lt.s32.totalorder %s2178_s12, %s2178_s12 }
  0x87   :  { %2195 = vmatmul.mubr.msk.f32.vlgmr.msra.gmra.mrb[0].mxu1 %vm146_vm3, %v128_v14  ;;  %230 = vmatprep.mubr.f32.mxu0 %v2805_v0  ;;  %v3058_v9 = vpack.c.bf16 %v335_v7, %v333_v6  ;;  %v337_v12 = vld [vmem:[#allocation3 + $0x68] sm:$0xff]  ;;  %v339_v13 = vld [vmem:[#allocation3 + $0x78] sm:$0xff]  ;;  %v3062_v14 = vpack.c.bf16 %v334_v11, %v332_v10  ;;  %v336_v16 = vld [vmem:[#allocation3 + $0x60] sm:$0xff]  ;;  %p2765_p0 = scmp.ne.s32.totalorder %s2178_s12, %s2764_s17  ;;  %p2770_p2 = scmp.lt.s32.totalorder %s2764_s17, %s2764_s17 }
  0x88   :  { %317 = vmatprep.mubr.f32.mxu1 %v2805_v0  ;;  %2262 = vmatprep.subr.bf16.mxu1 %v3045_v61  ;;  %v338_v19 = vld [vmem:[#allocation3 + $0x70] sm:$0xff] }
  0x89   :  { %2248 = vmatpush1.bf16.msra.mxu0 %v3047_v2  ;;  %2264 = vmatpush1.bf16.msra.mxu1 %v3047_v2  ;;  %p2771_p3 = por %p2770_p2, %p2769_p1 }
  0x8a   :  { %2192 = vmatmul.mubr.msk.f32.gmra.mrb[2].mxu0 %vm146_vm3, %v129_v15  ;;  %2250 = vmatprep.subr.bf16.mxu0 %v3049_v3 }
  0x8b   :  { %2196 = vmatmul.mubr.msk.f32.gmra.mrb[2].mxu1 %vm146_vm3, %v129_v15  ;;  %450 = vmatprep.mubr.f32.mxu0 %v2805_v0  ;;  %v3066_v15 = vpack.c.bf16 %v339_v13, %v337_v12  ;;  %p2772_p4 = pnand %p2771_p3, %p2765_p0 }
  0x8c   :  { %559 = vmatprep.mubr.f32.mxu1 %v2805_v0  ;;  %2266 = vmatprep.subr.bf16.mxu1 %v3049_v3 }
  0x8d   :  { %2252 = vmatpush1.bf16.msra.mxu0 %v3054_v8  ;;  %2268 = vmatpush1.bf16.msra.mxu1 %v3054_v8 }
  0x8e   :  { %2254 = vmatprep.subr.bf16.mxu0 %v3058_v9  ;;  %2270 = vmatprep.subr.bf16.mxu1 %v3058_v9 }
  0x91   :  { %2256 = vmatpush1.bf16.msra.mxu0 %v3062_v14  ;;  %2272 = vmatpush1.bf16.msra.mxu1 %v3062_v14 }
  0x92   :  { %2258 = vmatprep.subr.bf16.mxu0 %v3066_v15  ;;  %2274 = vmatprep.subr.bf16.mxu1 %v3066_v15 }
 0x159   :  { %v226_v22 = vpop.f32.mrb[0].mxu0 }
 0x15a   :  { %v313_v23 = vpop.f32.mrb[0].mxu1  ;;  %v228_v25 = vpop.f32.mrb[1].mxu0  ;;  %v227_v28 = vadd.f32 %v226_v22, %v139_v21  ;;  %v3071_v22 = vpack.c.bf16 %v338_v19, %v336_v16 }
 0x15b   :  { %v315_v26 = vpop.f32.mrb[1].mxu1  ;;  %v711_v27 = vrot.slane %v313_v23, 6  ;;  %v819_v30 = vrot.slane %v313_v23, 2  ;;  %v229_v32 = vadd.f32 %v228_v25, %v143_v24 }
 0x15c   :  { %v712_v31 = vrot.slane %v315_v26, 6  ;;  %v820_v36 = vrot.slane %v315_v26, 2  ;;  %2260 = vmatpush1.bf16.msra.mxu0 %v3071_v22  ;;  %2276 = vmatpush1.bf16.msra.mxu1 %v3071_v22 }
 0x15d   :  { %v232_v29 = vpop.f32.mrb[2].mxu0  ;;  %2278 = vmatprep.subr.bf16.mxu0 %v3045_v61  ;;  %2294 = vmatprep.subr.bf16.mxu1 %v3045_v61 }
 0x15e   :  { %v233_v33 = vadd.f32 %v232_v29, %v139_v21  ;;  %v319_v34 = vpop.f32.mrb[2].mxu1  ;;  %v234_v35 = vpop.f32.mrb[3].mxu0 }
 0x15f   :  { %v343_v37 = vrot.slane %v319_v34, 6  ;;  %v376_v38 = vrot.slane %v319_v34, 2  ;;  %v235_v39 = vadd.f32 %v234_v35, %v143_v24  ;;  %v321_v40 = vpop.f32.mrb[3].mxu1 }
 0x160   :  { %v3024_v41 = vadd.f32 %v819_v30, %v233_v33  ;;  %v344_v42 = vrot.slane %v321_v40, 6  ;;  %v377_v43 = vrot.slane %v321_v40, 2  ;;  %v3026_v44 = vadd.f32 %v711_v27, %v233_v33 }
 0x161   :  { %v3028_v45 = vadd.f32 %v343_v37, %v227_v28  ;;  %v3030_v46 = vadd.f32 %v376_v38, %v227_v28  ;;  %v3032_v47 = vadd.f32 %v712_v31, %v235_v39  ;;  %v3034_v48 = vadd.f32 %v820_v36, %v235_v39 }
 0x162   :  { %v3036_v49 = vadd.f32 %v344_v42, %v229_v32  ;;  %v3038_v50 = vadd.f32 %v377_v43, %v229_v32 }
 0x163   :  { %v2197_v51 = vmul.f32 -1.442695, %v3028_v45 }
 0x165   :  { %2514 = vpow2.f32 %v2197_v51 }
 0x16f   :  { %v2515_v52 = vpop.eup %2514 }
 0x170   :  { %v352_v53 = vadd.f32 1.0, %v2515_v52 }
 0x172   :  { %2516 = vrcp.f32 %v352_v53 }
 0x17c   :  { %v2517_v55 = vpop.eup %2516 }
 0x17d   :  { %v361_v56 = vmul.f32 %v2517_v55, %v3041_v54 }
 0x17f   :  { %v362_v57 = vadd.f32 %v361_v56, %v3036_v49 }
 0x181   :  { %2518 = vtanh.f32 %v362_v57 }
 0x18b   :  { %v2519_v21 = vpop.eup %2518 }
 0x18c   :  { %365 = vrot.lane.b32.xlu0 %v2519_v21, %s2807_s0 }
 0x1fe   :  { %v366_v23 = vpop.permute.xlu0 %365 }
 0x1ff   :  { %v368_v24 = vmul.f32 %v2517_v55, %v366_v23 }
 0x201   :  { %370 = vrot.lane.b32.xlu0 %v368_v24, %s2807_s0 }
 0x273   :  { %v371_v25 = vpop.permute.xlu0 %370 }
 0x274   :  { %v373_v26 = vsub.f32 %v2519_v21, %v371_v25 }
 0x276   :  { %375 = vst.msk [vmem:[#allocation2] sm:$0x3] %vm374_vm4, %v373_v26  ;;  %2199 = vmatmul.mubr.msk.f32.vlgmr.msra.gmra.mrb[4].mxu0 %vm382_vm5, %v373_v26 }
 0x277   :  { %2280 = vmatpush1.bf16.msra.mxu0 %v3047_v2  ;;  %668 = vmatprep.mubr.f32.mxu0 %v2805_v0 }
 0x278   :  { %2282 = vmatprep.subr.bf16.mxu0 %v3049_v3 }
 0x27b   :  { %2284 = vmatpush1.bf16.msra.mxu0 %v3054_v8 }
 0x27c   :  { %2286 = vmatprep.subr.bf16.mxu0 %v3058_v9 }
 0x27f   :  { %2288 = vmatpush1.bf16.msra.mxu0 %v3062_v14 }
 0x280   :  { %2290 = vmatprep.subr.bf16.mxu0 %v3066_v15 }
 0x283   :  { %2292 = vmatpush1.bf16.msra.mxu0 %v3071_v22 }
 0x284   :  { %2310 = vmatprep.subr.bf16.mxu0 %v3045_v61 }
 0x349   :  { %v452_v27 = vpop.f32.mrb[4].mxu0 }
 0x34a   :  { %v458_v28 = vrot.slane %v452_v27, 6  ;;  %v454_v29 = vpop.f32.mrb[5].mxu0 }
 0x34b   :  { %v467_v34 = vadd.f32 %v3041_v54, %v454_v29 }
 0x34c   :  { %v460_v30 = vadd.f32 %v458_v28, %v3030_v46 }
 0x34d   :  { %v469_v35 = vrot.slane %v467_v34, 6 }
 0x34e   :  { %v2200_v31 = vmul.f32 -1.442695, %v460_v30 }
 0x350   :  { %2520 = vpow2.f32 %v2200_v31 }
 0x35a   :  { %v2521_v32 = vpop.eup %2520 }
 0x35b   :  { %v464_v33 = vadd.f32 1.0, %v2521_v32 }
 0x35d   :  { %2522 = vrcp.f32 %v464_v33 }
 0x367   :  { %v2523_v36 = vpop.eup %2522 }
 0x368   :  { %v471_v37 = vmul.f32 %v2523_v36, %v469_v35 }
 0x36a   :  { %v472_v38 = vadd.f32 %v471_v37, %v3038_v50 }
 0x36c   :  { %2524 = vtanh.f32 %v472_v38 }
 0x376   :  { %v2525_v39 = vpop.eup %2524 }
 0x377   :  { %v475_v40 = vrot.slane %v2525_v39, 2 }
 0x379   :  { %v477_v42 = vsub.f32 %v373_v26, %v475_v40 }
 0x37b   :  { %v479_v43 = vrot.slane %v477_v42, 6 }
 0x37d   :  { %480 = vrot.lane.b32.xlu1 %v479_v43, %s2807_s0 }
 0x3ef   :  { %v481_v51 = vpop.permute.xlu1 %480 }
 0x3f0   :  { %v483_v52 = vmul.f32 %v2523_v36, %v481_v51 }
 0x3f2   :  { %485 = vrot.lane.b32.xlu1 %v483_v52, %s2807_s0 }
 0x464   :  { %v486_v53 = vpop.permute.xlu1 %485 }
 0x465   :  { %v488_v55 = vadd.f32 %v2525_v39, %v486_v53 }
 0x467   :  { %490 = vst.msk [vmem:[#allocation2] sm:$0xc] %vm489_vm6, %v488_v55  ;;  %v492_v56 = vrot.slane %v488_v55, 2 }
 0x469   :  { %2201 = vmatmul.mubr.msk.f32.vlgmr.msra.gmra.mrb[4].mxu1 %vm382_vm5, %v492_v56 }
 0x46a   :  { %2296 = vmatpush1.bf16.msra.mxu1 %v3047_v2  ;;  %785 = vmatprep.mubr.f32.mxu1 %v2805_v0 }
 0x46b   :  { %2298 = vmatprep.subr.bf16.mxu1 %v3049_v3 }
 0x46e   :  { %2300 = vmatpush1.bf16.msra.mxu1 %v3054_v8 }
 0x46f   :  { %2302 = vmatprep.subr.bf16.mxu1 %v3058_v9 }
 0x472   :  { %2304 = vmatpush1.bf16.msra.mxu1 %v3062_v14 }
 0x473   :  { %2306 = vmatprep.subr.bf16.mxu1 %v3066_v15 }
 0x476   :  { %2308 = vmatpush1.bf16.msra.mxu1 %v3071_v22 }
 0x477   :  { %2326 = vmatprep.subr.bf16.mxu1 %v3045_v61 }
 0x53c   :  { %v561_v57 = vpop.f32.mrb[4].mxu1 }
 0x53d   :  { %v567_v58 = vrot.slane %v561_v57, 4  ;;  %v563_v59 = vpop.f32.mrb[5].mxu1 }
 0x53e   :  { %v576_v4 = vadd.f32 %v3041_v54, %v563_v59 }
 0x53f   :  { %v569_v60 = vadd.f32 %v567_v58, %v3028_v45 }
 0x540   :  { %v578_v5 = vrot.slane %v576_v4, 4 }
 0x541   :  { %v2202_v62 = vmul.f32 -1.442695, %v569_v60 }
 0x543   :  { %2526 = vpow2.f32 %v2202_v62 }
 0x54d   :  { %v2527_v63 = vpop.eup %2526 }
 0x54e   :  { %v573_v1 = vadd.f32 1.0, %v2527_v63 }
 0x550   :  { %2528 = vrcp.f32 %v573_v1 }
 0x55a   :  { %v2529_v6 = vpop.eup %2528 }
 0x55b   :  { %v580_v7 = vmul.f32 %v2529_v6, %v578_v5 }
 0x55d   :  { %v581_v10 = vadd.f32 %v580_v7, %v3036_v49 }
 0x55f   :  { %2530 = vtanh.f32 %v581_v10 }
 0x569   :  { %v2531_v11 = vpop.eup %2530 }
 0x56a   :  { %v584_v12 = vrot.slane %v2531_v11, 2 }
 0x56c   :  { %v586_v13 = vsub.f32 %v488_v55, %v584_v12 }
 0x56e   :  { %v588_v16 = vrot.slane %v586_v13, 6 }
 0x570   :  { %589 = vrot.lane.b32.xlu0 %v588_v16, %s2807_s0 }
 0x5e2   :  { %v590_v45 = vpop.permute.xlu0 %589 }
 0x5e3   :  { %v592_v19 = vmul.f32 %v2529_v6, %v590_v45 }
 0x5e5   :  { %594 = vrot.lane.b32.xlu1 %v592_v19, %s2807_s0 }
 0x657   :  { %v595_v21 = vpop.permute.xlu1 %594 }
 0x658   :  { %v597_v23 = vadd.f32 %v2531_v11, %v595_v21 }
 0x65a   :  { %599 = vst.msk [vmem:[#allocation2] sm:$0x30] %vm598_vm7, %v597_v23  ;;  %v601_v24 = vrot.slane %v597_v23, 4 }
 0x65c   :  { %2203 = vmatmul.mubr.msk.f32.vlgmr.msra.gmra.mrb[6].mxu0 %vm382_vm5, %v601_v24 }
 0x65d   :  { %2312 = vmatpush1.bf16.msra.mxu0 %v3047_v2  ;;  %892 = vmatprep.mubr.f32.mxu0 %v2805_v0 }
 0x65e   :  { %2314 = vmatprep.subr.bf16.mxu0 %v3049_v3 }
 0x661   :  { %2316 = vmatpush1.bf16.msra.mxu0 %v3054_v8 }
 0x662   :  { %2318 = vmatprep.subr.bf16.mxu0 %v3058_v9 }
 0x665   :  { %2320 = vmatpush1.bf16.msra.mxu0 %v3062_v14 }
 0x666   :  { %2322 = vmatprep.subr.bf16.mxu0 %v3066_v15 }
 0x669   :  { %2324 = vmatpush1.bf16.msra.mxu0 %v3071_v22 }
 0x66a   :  { %2342 = vmatprep.subr.bf16.mxu0 %v3045_v61 }
 0x72f   :  { %v670_v49 = vpop.f32.mrb[6].mxu0 }
 0x730   :  { %v676_v25 = vrot.slane %v670_v49, 2  ;;  %v672_v26 = vpop.f32.mrb[7].mxu0  ;;  %v1151_v49 = vld [vmem:[#allocation8 + $0x8] sm:$0xff] }
 0x731   :  { %v685_v31 = vadd.f32 %v3041_v54, %v672_v26 }
 0x732   :  { %v678_v27 = vadd.f32 %v676_v25, %v3030_v46  ;;  %v1153_v25 = vld [vmem:[#allocation8 + $0x18] sm:$0xff] }
 0x733   :  { %v687_v32 = vrot.slane %v685_v31, 2  ;;  %v2357_v26 = vpack.c.bf16 %v1153_v25, %v1151_v49  ;;  %v1266_v49 = vld [vmem:[#allocation9 + $0x28] sm:$0xff] }
 0x734   :  { %v2204_v28 = vmul.f32 -1.442695, %v678_v27 }
 0x736   :  { %2532 = vpow2.f32 %v2204_v28 }
 0x740   :  { %v2533_v29 = vpop.eup %2532 }
 0x741   :  { %v682_v30 = vadd.f32 1.0, %v2533_v29  ;;  %v1150_v29 = vld [vmem:[#allocation8] sm:$0xff] }
 0x743   :  { %2534 = vrcp.f32 %v682_v30  ;;  %v1152_v30 = vld [vmem:[#allocation8 + $0x10] sm:$0xff] }
 0x74d   :  { %v2535_v33 = vpop.eup %2534 }
 0x74e   :  { %v689_v34 = vmul.f32 %v2535_v33, %v687_v32  ;;  %v1155_v32 = vld [vmem:[#allocation8 + $0x28] sm:$0xff] }
 0x750   :  { %v690_v35 = vadd.f32 %v689_v34, %v3038_v50 }
 0x752   :  { %2536 = vtanh.f32 %v690_v35  ;;  %v2359_v35 = vpack.c.bf16 %v1152_v30, %v1150_v29  ;;  %v1265_v29 = vld [vmem:[#allocation9 + $0x20] sm:$0xff]  ;;  %v1267_v30 = vld [vmem:[#allocation9 + $0x30] sm:$0xff] }
 0x75c   :  { %v2537_v36 = vpop.eup %2536 }
 0x75d   :  { %v693_v61 = vrot.slane %v2537_v36, 2 }
 0x75f   :  { %v695_v37 = vsub.f32 %v597_v23, %v693_v61 }
 0x761   :  { %v697_v38 = vrot.slane %v695_v37, 6  ;;  %v1154_v37 = vld [vmem:[#allocation8 + $0x20] sm:$0xff] }
 0x763   :  { %698 = vrot.lane.b32.xlu0 %v697_v38, %s2807_s0  ;;  %v1156_v38 = vld [vmem:[#allocation8 + $0x30] sm:$0xff] }
 0x7d5   :  { %v699_v46 = vpop.permute.xlu0 %698 }
 0x7d6   :  { %v701_v39 = vmul.f32 %v2535_v33, %v699_v46  ;;  %v1157_v33 = vld [vmem:[#allocation8 + $0x38] sm:$0xff]  ;;  %v1159_v46 = vld [vmem:[#allocation8 + $0x48] sm:$0xff] }
 0x7d7   :  { %v2361_v61 = vpack.c.bf16 %v1157_v33, %v1155_v32  ;;  %v1272_v32 = vld [vmem:[#allocation9 + $0x58] sm:$0xff]  ;;  %v2379_v33 = vpack.c.bf16 %v1267_v30, %v1265_v29 }
 0x7d8   :  { %703 = vrot.lane.b32.xlu1 %v701_v39, %s2807_s0  ;;  %v1161_v39 = vld [vmem:[#allocation8 + $0x58] sm:$0xff] }
 0x84a   :  { %v704_v40 = vpop.permute.xlu1 %703 }
 0x84b   :  { %v706_v42 = vadd.f32 %v2537_v36, %v704_v40  ;;  %v2363_v40 = vpack.c.bf16 %v1156_v38, %v1154_v37  ;;  %v1276_v37 = vld [vmem:[#allocation9 + $0x78] sm:$0xff] }
 0x84d   :  { %708 = vst.msk [vmem:[#allocation2] sm:$0xc0] %vm707_vm8, %v706_v42  ;;  %v718_v43 = vrot.slane %v706_v42, 6 }
 0x84f   :  { %2205 = vmatmul.mubr.msk.f32.vlgmr.msra.gmra.mrb[6].mxu1 %vm382_vm5, %v718_v43  ;;  %v1158_v43 = vld [vmem:[#allocation8 + $0x40] sm:$0xff] }
 0x850   :  { %2328 = vmatpush1.bf16.msra.mxu1 %v3047_v2  ;;  %1000 = vmatprep.mubr.f32.mxu1 %v2805_v0 }
 0x851   :  { %2330 = vmatprep.subr.bf16.mxu1 %v3049_v3 }
 0x854   :  { %2332 = vmatpush1.bf16.msra.mxu1 %v3054_v8 }
 0x855   :  { %2334 = vmatprep.subr.bf16.mxu1 %v3058_v9 }
 0x858   :  { %2336 = vmatpush1.bf16.msra.mxu1 %v3062_v14 }
 0x859   :  { %2338 = vmatprep.subr.bf16.mxu1 %v3066_v15 }
 0x85c   :  { %2340 = vmatpush1.bf16.msra.mxu1 %v3071_v22 }
 0x85d   :  { %2358 = vmatprep.subr.bf16.mxu1 %v2357_v26 }
 0x922   :  { %v787_v50 = vpop.f32.mrb[6].mxu1 }
 0x923   :  { %v792_v51 = vadd.f32 %v787_v50, %v3026_v44  ;;  %v789_v52 = vpop.f32.mrb[7].mxu1  ;;  %v1160_v50 = vld [vmem:[#allocation8 + $0x50] sm:$0xff] }
 0x924   :  { %v799_v57 = vadd.f32 %v3041_v54, %v789_v52  ;;  %v1165_v52 = vld [vmem:[#allocation8 + $0x78] sm:$0xff] }
 0x925   :  { %v2206_v53 = vmul.f32 -1.442695, %v792_v51  ;;  %v1163_v51 = vld [vmem:[#allocation8 + $0x68] sm:$0xff] }
 0x927   :  { %2538 = vpow2.f32 %v2206_v53  ;;  %v2367_v53 = vpack.c.bf16 %v1160_v50, %v1158_v43 }
 0x931   :  { %v2539_v55 = vpop.eup %2538 }
 0x932   :  { %v796_v56 = vadd.f32 1.0, %v2539_v55  ;;  %v2369_v55 = vpack.c.bf16 %v1165_v52, %v1163_v51 }
 0x934   :  { %2540 = vrcp.f32 %v796_v56  ;;  %v1162_v56 = vld [vmem:[#allocation8 + $0x60] sm:$0xff] }
 0x93e   :  { %v2541_v58 = vpop.eup %2540 }
 0x93f   :  { %v800_v59 = vmul.f32 %v2541_v58, %v799_v57  ;;  %v1164_v57 = vld [vmem:[#allocation8 + $0x70] sm:$0xff] }
 0x941   :  { %v801_v60 = vadd.f32 %v800_v59, %v3032_v47  ;;  %v3162_v59 = vld [vmem:[#allocation2] sm:$0xff] }
 0x943   :  { %2542 = vtanh.f32 %v801_v60 }
 0x94d   :  { %v2543_v62 = vpop.eup %2542 }
 0x94e   :  { %v804_v63 = vrot.slane %v2543_v62, 2 }
 0x950   :  { %v806_v1 = vsub.f32 %v706_v42, %v804_v63  ;;  %v2365_v42 = vpack.c.bf16 %v1161_v39, %v1159_v46  ;;  %v1273_v39 = vld [vmem:[#allocation9 + $0x60] sm:$0xff] }
 0x952   :  { %v808_v4 = vrot.slane %v806_v1, 6 }
 0x954   :  { %809 = vrot.lane.b32.xlu0 %v808_v4, %s2807_s0 }
 0x9c6   :  { %v810_v5 = vpop.permute.xlu0 %809 }
 0x9c7   :  { %v812_v6 = vmul.f32 %v2541_v58, %v810_v5  ;;  %v2371_v58 = vpack.c.bf16 %v1164_v57, %v1162_v56 }
 0x9c9   :  { %814 = vrot.lane.b32.xlu1 %v812_v6, %s2807_s0 }
 0xa3b   :  { %v815_v7 = vpop.permute.xlu1 %814 }
 0xa3c   :  { %v817_v10 = vadd.f32 %v2543_v62, %v815_v7 }
 0xa3e   :  { %818 = vst.msk [vmem:[#allocation2 + $0x8] sm:$0x3] %vm374_vm4, %v817_v10  ;;  %2207 = vmatmul.mubr.msk.f32.vlgmr.msra.gmra.mrb[8].mxu0 %vm382_vm5, %v817_v10 }
 0xa3f   :  { %2344 = vmatpush1.bf16.msra.mxu0 %v3047_v2  ;;  %1108 = vmatprep.mubr.f32.mxu0 %v2805_v0 }
 0xa40   :  { %2346 = vmatprep.subr.bf16.mxu0 %v3049_v3 }
 0xa43   :  { %2348 = vmatpush1.bf16.msra.mxu0 %v3054_v8 }
 0xa44   :  { %2350 = vmatprep.subr.bf16.mxu0 %v3058_v9 }
 0xa47   :  { %2352 = vmatpush1.bf16.msra.mxu0 %v3062_v14 }
 0xa48   :  { %2354 = vmatprep.subr.bf16.mxu0 %v3066_v15 }
 0xa4b   :  { %2356 = vmatpush1.bf16.msra.mxu0 %v3071_v22 }
 0xb11   :  { %v894_v11 = vpop.f32.mrb[8].mxu0 }
 0xb12   :  { %v900_v12 = vrot.slane %v894_v11, 6  ;;  %v896_v13 = vpop.f32.mrb[9].mxu0 }
 0xb13   :  { %v909_v3 = vadd.f32 %v3041_v54, %v896_v13 }
 0xb14   :  { %v902_v16 = vadd.f32 %v900_v12, %v3024_v41 }
 0xb15   :  { %v911_v8 = vrot.slane %v909_v3, 6 }
 0xb16   :  { %v2208_v2 = vmul.f32 -1.442695, %v902_v16 }
 0xb18   :  { %2544 = vpow2.f32 %v2208_v2 }
 0xb22   :  { %v2545_v45 = vpop.eup %2544 }
 0xb23   :  { %v906_v19 = vadd.f32 1.0, %v2545_v45 }
 0xb25   :  { %2546 = vrcp.f32 %v906_v19 }
 0xb2f   :  { %v2547_v9 = vpop.eup %2546 }
 0xb30   :  { %v913_v21 = vmul.f32 %v2547_v9, %v911_v8  ;;  %v1262_v8 = vld [vmem:[#allocation9 + $0x8] sm:$0xff] }
 0xb32   :  { %v914_v14 = vadd.f32 %v913_v21, %v3034_v48 }
 0xb34   :  { %2548 = vtanh.f32 %v914_v14 }
 0xb3e   :  { %v2549_v15 = vpop.eup %2548 }
 0xb3f   :  { %v917_v22 = vrot.slane %v2549_v15, 2 }
 0xb41   :  { %v919_v23 = vsub.f32 %v817_v10, %v917_v22  ;;  %v1261_v22 = vld [vmem:[#allocation9] sm:$0xff] }
 0xb43   :  { %v921_v24 = vrot.slane %v919_v23, 6  ;;  %v1263_v23 = vld [vmem:[#allocation9 + $0x10] sm:$0xff] }
 0xb44   :  { %v2375_v26 = vpack.c.bf16 %v1263_v23, %v1261_v22 }
 0xb45   :  { %922 = vrot.lane.b32.xlu0 %v921_v24, %s2807_s0 }
 0xbb7   :  { %v923_v27 = vpop.permute.xlu0 %922 }
 0xbb8   :  { %v925_v28 = vmul.f32 %v2547_v9, %v923_v27  ;;  %v1264_v9 = vld [vmem:[#allocation9 + $0x18] sm:$0xff] }
 0xbb9   :  { %v2373_v21 = vpack.c.bf16 %v1264_v9, %v1262_v8 }
 0xbba   :  { %927 = vrot.lane.b32.xlu1 %v925_v28, %s2807_s0 }
 0xbbb   :  { %2374 = vmatprep.subr.bf16.mxu0 %v2373_v21 }
 0xc2c   :  { %v928_v31 = vpop.permute.xlu1 %927 }
 0xc2d   :  { %v930_v34 = vadd.f32 %v2549_v15, %v928_v31  ;;  %v1270_v31 = vld [vmem:[#allocation9 + $0x48] sm:$0xff] }
 0xc2f   :  { %931 = vst.msk [vmem:[#allocation2 + $0x8] sm:$0xc] %vm489_vm6, %v930_v34  ;;  %v933_v36 = vrot.slane %v930_v34, 2 }
 0xc31   :  { %2209 = vmatmul.mubr.msk.f32.vlgmr.msra.gmra.mrb[8].mxu1 %vm382_vm5, %v933_v36  ;;  %v1271_v36 = vld [vmem:[#allocation9 + $0x50] sm:$0xff] }
 0xc32   :  { %2360 = vmatpush1.bf16.msra.mxu1 %v2359_v35  ;;  %1248 = vmatprep.mubr.f32.mxu1 %v2805_v0  ;;  %v1269_v35 = vld [vmem:[#allocation9 + $0x40] sm:$0xff] }
 0xc33   :  { %2362 = vmatprep.subr.bf16.mxu1 %v2361_v61  ;;  %v1274_v61 = vld [vmem:[#allocation9 + $0x68] sm:$0xff]  ;;  %v2383_v38 = vpack.c.bf16 %v1271_v36, %v1269_v35 }
 0xc34   :  { %v2385_v46 = vpack.c.bf16 %v1276_v37, %v1274_v61  ;;  %v1355_v37 = vld [vmem:[#allocation12 + $0x8] sm:$0xff] }
 0xc36   :  { %2364 = vmatpush1.bf16.msra.mxu1 %v2363_v40  ;;  %v1275_v40 = vld [vmem:[#allocation9 + $0x70] sm:$0xff] }
 0xc37   :  { %2366 = vmatprep.subr.bf16.mxu1 %v2365_v42  ;;  %v2387_v42 = vpack.c.bf16 %v1275_v40, %v1273_v39  ;;  %v1356_v40 = vld [vmem:[#allocation12 + $0x10] sm:$0xff] }
 0xc3a   :  { %2368 = vmatpush1.bf16.msra.mxu1 %v2367_v53 }
 0xc3b   :  { %2370 = vmatprep.subr.bf16.mxu1 %v2369_v55 }
 0xc3e   :  { %2372 = vmatpush1.bf16.msra.mxu1 %v2371_v58 }
 0xc41   :  { %2213 = vmatmul.mubr.msk.f32.vlgmr.msra.gmra.mrb[10].mxu1 %vm382_vm5, %v3162_v59 }
 0xc42   :  { %1254 = vmatprep.mubr.f32.mxu1 %v2805_v0 }
 0xd04   :  { %v1002_v60 = vpop.f32.mrb[8].mxu1 }
 0xd05   :  { %v1008_v62 = vrot.slane %v1002_v60, 4  ;;  %v1004_v63 = vpop.f32.mrb[9].mxu1 }
 0xd06   :  { %v1017_v11 = vadd.f32 %v3041_v54, %v1004_v63 }
 0xd07   :  { %v1010_v1 = vadd.f32 %v1008_v62, %v3026_v44 }
 0xd08   :  { %v1019_v12 = vrot.slane %v1017_v11, 4 }
 0xd09   :  { %v2210_v4 = vmul.f32 -1.442695, %v1010_v1 }
 0xd0b   :  { %2550 = vpow2.f32 %v2210_v4 }
 0xd14   :  { %v3168_v5 = vpop.f32.mrb[10].mxu1 }
 0xd15   :  { %v2551_v6 = vpop.eup %2550  ;;  %v3170_v7 = vpop.f32.mrb[11].mxu1 }
 0xd16   :  { %v1014_v10 = vadd.f32 1.0, %v2551_v6 }
 0xd18   :  { %2552 = vrcp.f32 %v1014_v10 }
 0xd22   :  { %v2553_v13 = vpop.eup %2552 }
 0xd23   :  { %v1021_v16 = vmul.f32 %v2553_v13, %v1019_v12 }
 0xd25   :  { %v1022_v2 = vadd.f32 %v1021_v16, %v3032_v47  ;;  %v1268_v47 = vld [vmem:[#allocation9 + $0x38] sm:$0xff] }
 0xd26   :  { %v2377_v28 = vpack.c.bf16 %v1268_v47, %v1266_v49 }
 0xd27   :  { %2554 = vtanh.f32 %v1022_v2 }
 0xd31   :  { %v2555_v45 = vpop.eup %2554 }
 0xd32   :  { %v1025_v19 = vrot.slane %v2555_v45, 2 }
 0xd34   :  { %v1027_v44 = vsub.f32 %v930_v34, %v1025_v19  ;;  %v2381_v34 = vpack.c.bf16 %v1272_v32, %v1270_v31 }
 0xd36   :  { %v1029_v3 = vrot.slane %v1027_v44, 6 }
 0xd38   :  { %1030 = vrot.lane.b32.xlu0 %v1029_v3, %s2807_s0 }
 0xdaa   :  { %v1031_v14 = vpop.permute.xlu0 %1030 }
 0xdab   :  { %v1033_v15 = vmul.f32 %v2553_v13, %v1031_v14 }
 0xdad   :  { %1035 = vrot.lane.b32.xlu1 %v1033_v15, %s2807_s0 }
 0xe1f   :  { %v1036_v24 = vpop.permute.xlu1 %1035 }
 0xe20   :  { %v1038_v25 = vadd.f32 %v2555_v45, %v1036_v24 }
 0xe22   :  { %1039 = vst.msk [vmem:[#allocation2 + $0x8] sm:$0x30] %vm598_vm7, %v1038_v25  ;;  %v1041_v27 = vrot.slane %v1038_v25, 4 }
 0xe24   :  { %2211 = vmatmul.mubr.msk.f32.vlgmr.msra.gmra.mrb[10].mxu0 %vm382_vm5, %v1041_v27 }
 0xe25   :  { %2376 = vmatpush1.bf16.msra.mxu0 %v2375_v26  ;;  %1341 = vmatprep.mubr.f32.mxu0 %v2805_v0 }
 0xe26   :  { %2378 = vmatprep.subr.bf16.mxu0 %v2377_v28 }
 0xe29   :  { %2380 = vmatpush1.bf16.msra.mxu0 %v2379_v33 }
 0xe2a   :  { %2382 = vmatprep.subr.bf16.mxu0 %v2381_v34  ;;  %v3218_v34 = vld [vmem:[#allocation14] ss:$0 sm:$0xff] }
 0xe2d   :  { %2384 = vmatpush1.bf16.msra.mxu0 %v2383_v38  ;;  %v1357_v38 = vld [vmem:[#allocation12 + $0x18] sm:$0xff] }
 0xe2e   :  { %2386 = vmatprep.subr.bf16.mxu0 %v2385_v46  ;;  %v1354_v46 = vld [vmem:[#allocation12] sm:$0xff]  ;;  %v3222_v39 = vpack.c.bf16 %v1357_v38, %v1355_v37 }
 0xe30   :  { %2390 = vmatprep.subr.bf16.mxu1 %v3222_v39 }
 0xe31   :  { %2388 = vmatpush1.bf16.msra.mxu0 %v2387_v42  ;;  %v1359_v42 = vld [vmem:[#allocation12 + $0x28] sm:$0xff] }
 0xe32   :  { %2406 = vmatprep.subr.bf16.mxu0 %v3222_v39 }
 0xe34   :  { %2215 = vmatmul.mubr.msk.f32.vlgmr.msra.gmra.mrb[12].mxu0 %vm382_vm5, %v3162_v59 }
 0xe35   :  { %1347 = vmatprep.mubr.f32.mxu0 %v2805_v0 }
 0xef7   :  { %v1110_v43 = vpop.f32.mrb[10].mxu0 }
 0xef8   :  { %v1116_v50 = vrot.slane %v1110_v43, 2  ;;  %v1112_v51 = vpop.f32.mrb[11].mxu0  ;;  %v1361_v43 = vld [vmem:[#allocation12 + $0x38] sm:$0xff] }
 0xef9   :  { %v1125_v60 = vadd.f32 %v3041_v54, %v1112_v51  ;;  %v3226_v51 = vpack.c.bf16 %v1361_v43, %v1359_v42 }
 0xefa   :  { %v1118_v52 = vadd.f32 %v1116_v50, %v3024_v41  ;;  %v3224_v50 = vpack.c.bf16 %v1356_v40, %v1354_v46 }
 0xefb   :  { %v1127_v62 = vrot.slane %v1125_v60, 2  ;;  %v1362_v60 = vld [vmem:[#allocation12 + $0x40] sm:$0xff] }
 0xefc   :  { %v2212_v53 = vmul.f32 -1.442695, %v1118_v52  ;;  %v1358_v52 = vld [vmem:[#allocation12 + $0x20] sm:$0xff]  ;;  %2392 = vmatpush1.bf16.msra.mxu1 %v3224_v50  ;;  %2408 = vmatpush1.bf16.msra.mxu0 %v3224_v50 }
 0xefd   :  { %2394 = vmatprep.subr.bf16.mxu1 %v3226_v51  ;;  %2410 = vmatprep.subr.bf16.mxu0 %v3226_v51 }
 0xefe   :  { %2556 = vpow2.f32 %v2212_v53  ;;  %v1360_v53 = vld [vmem:[#allocation12 + $0x30] sm:$0xff] }
 0xf07   :  { %v1343_v55 = vpop.f32.mrb[12].mxu0 }
 0xf08   :  { %v2557_v56 = vpop.eup %2556  ;;  %v1345_v57 = vpop.f32.mrb[13].mxu0  ;;  %v1732_v3 = vrot.slane %v1343_v55, 6  ;;  %v1839_v8 = vrot.slane %v1343_v55, 2  ;;  %v1363_v55 = vld [vmem:[#allocation12 + $0x48] sm:$0xff] }
 0xf09   :  { %v1122_v58 = vadd.f32 1.0, %v2557_v56  ;;  %v1733_v14 = vrot.slane %v1345_v57, 6  ;;  %v1840_v47 = vrot.slane %v1345_v57, 2  ;;  %v1365_v56 = vld [vmem:[#allocation12 + $0x58] sm:$0xff]  ;;  %v3231_v57 = vpack.c.bf16 %v1360_v53, %v1358_v52 }
 0xf0b   :  { %2558 = vrcp.f32 %v1122_v58  ;;  %v3235_v58 = vpack.c.bf16 %v1365_v56, %v1363_v55  ;;  %2396 = vmatpush1.bf16.msra.mxu1 %v3231_v57  ;;  %2412 = vmatpush1.bf16.msra.mxu0 %v3231_v57 }
 0xf0d   :  { %2398 = vmatprep.subr.bf16.mxu1 %v3235_v58  ;;  %2414 = vmatprep.subr.bf16.mxu0 %v3235_v58 }
 0xf15   :  { %v2559_v63 = vpop.eup %2558 }
 0xf16   :  { %v1129_v1 = vmul.f32 %v2559_v63, %v1127_v62  ;;  %v1364_v62 = vld [vmem:[#allocation12 + $0x50] sm:$0xff] }
 0xf18   :  { %v1130_v59 = vadd.f32 %v1129_v1, %v3034_v48  ;;  %v1166_v48 = vld [vmem:[#allocation11] sm:$0x3] }
 0xf19   :  { %v1171_v2 = vrot.slane %v1166_v48, %v138_v18  ;;  %v1175_v45 = vrot.slane %v1166_v48, %v142_v20  ;;  %v1369_v1 = vld [vmem:[#allocation12 + $0x78] sm:$0xff] }
 0xf1a   :  { %2560 = vtanh.f32 %v1130_v59  ;;  %v3239_v59 = vpack.c.bf16 %v1364_v62, %v1362_v60 }
 0xf1b   :  { %v1251_v19 = vadd.f32 %v3168_v5, %v1171_v2  ;;  %v1253_v44 = vadd.f32 %v3170_v7, %v1175_v45 }
 0xf1c   :  { %2400 = vmatpush1.bf16.msra.mxu1 %v3239_v59  ;;  %2416 = vmatpush1.bf16.msra.mxu0 %v3239_v59 }
 0xf24   :  { %v2561_v4 = vpop.eup %2560 }
 0xf25   :  { %v1133_v6 = vrot.slane %v2561_v4, 2 }
 0xf27   :  { %v1135_v10 = vsub.f32 %v1038_v25, %v1133_v6  ;;  %v1366_v6 = vld [vmem:[#allocation12 + $0x60] sm:$0xff] }
 0xf29   :  { %v1137_v11 = vrot.slane %v1135_v10, 6  ;;  %v1368_v10 = vld [vmem:[#allocation12 + $0x70] sm:$0xff] }
 0xf2b   :  { %1138 = vrot.lane.b32.xlu0 %v1137_v11, %s2807_s0 }
 0xf9d   :  { %v1139_v41 = vpop.permute.xlu0 %1138 }
 0xf9e   :  { %v1141_v12 = vmul.f32 %v2559_v63, %v1139_v41  ;;  %v1367_v63 = vld [vmem:[#allocation12 + $0x68] sm:$0xff]  ;;  %v3248_v41 = vpack.c.bf16 %v1368_v10, %v1366_v6 }
 0xfa0   :  { %1143 = vrot.lane.b32.xlu1 %v1141_v12, %s2807_s0 }
0x1012   :  { %v1144_v13 = vpop.permute.xlu1 %1143 }
0x1013   :  { %v3187_v16 = vadd.f32 %v2561_v4, %v1144_v13  ;;  %v3243_v4 = vpack.c.bf16 %v1369_v1, %v1367_v63 }
0x1015   :  { %1147 = vst.msk [vmem:[#allocation2 + $0x8] sm:$0xc0] %vm707_vm8, %v3187_v16  ;;  %2402 = vmatprep.subr.bf16.mxu1 %v3243_v4  ;;  %2418 = vmatprep.subr.bf16.mxu0 %v3243_v4 }
0x1016   :  { %2404 = vmatpush1.bf16.msra.mxu1 %v3248_v41  ;;  %2420 = vmatpush1.bf16.msra.mxu0 %v3248_v41 }
0x1017   :  { %2422 = vmatprep.subr.bf16.mxu1 %v3222_v39  ;;  %2438 = vmatprep.subr.bf16.mxu0 %v3222_v39 }
0x101c   :  { %v1149_v54 = vld [vmem:[#allocation2 + $0x8] sm:$0xff] }
0x101d   :  { %2214 = vmatmul.mubr.msk.f32.gmra.mrb[12].mxu1 %vm382_vm5, %v1149_v54  ;;  %2216 = vmatmul.mubr.msk.f32.gmra.mrb[14].mxu0 %vm382_vm5, %v1149_v54 }
0x101e   :  { %1477 = vmatprep.mubr.f32.mxu1 %v2805_v0  ;;  %1584 = vmatprep.mubr.f32.mxu0 %v2805_v0 }
0x10f0   :  { %v1256_v9 = vpop.f32.mrb[12].mxu1  ;;  %v1349_v21 = vpop.f32.mrb[14].mxu0 }
0x10f1   :  { %v1257_v15 = vadd.f32 %v1256_v9, %v1171_v2  ;;  %v1373_v22 = vrot.slane %v1349_v21, 6  ;;  %v1404_v23 = vrot.slane %v1349_v21, 2  ;;  %v1258_v24 = vpop.f32.mrb[13].mxu1  ;;  %v1351_v49 = vpop.f32.mrb[15].mxu0 }
0x10f2   :  { %v1259_v25 = vadd.f32 %v1258_v24, %v1175_v45  ;;  %v1374_v18 = vrot.slane %v1351_v49, 6  ;;  %v1405_v26 = vrot.slane %v1351_v49, 2 }
0x10f3   :  { %v3201_v17 = vadd.f32 %v1839_v8, %v1257_v15  ;;  %v3203_v20 = vadd.f32 %v1373_v22, %v1251_v19  ;;  %v3205_v5 = vadd.f32 %v1404_v23, %v1251_v19  ;;  %v3207_v7 = vadd.f32 %v1732_v3, %v1257_v15 }
0x10f4   :  { %v3209_v27 = vadd.f32 %v1733_v14, %v1259_v25  ;;  %v3211_v28 = vadd.f32 %v1840_v47, %v1259_v25  ;;  %v3213_v29 = vadd.f32 %v1374_v18, %v1253_v44  ;;  %v3215_v30 = vadd.f32 %v1405_v26, %v1253_v44 }
0x10f5   :  { %v2217_v31 = vmul.f32 -1.442695, %v3203_v20 }
0x10f7   :  { %2562 = vpow2.f32 %v2217_v31 }
0x1101   :  { %v2563_v32 = vpop.eup %2562 }
0x1102   :  { %v1382_v33 = vadd.f32 1.0, %v2563_v32 }
0x1104   :  { %2564 = vrcp.f32 %v1382_v33 }
0x110e   :  { %v2565_v35 = vpop.eup %2564 }
0x110f   :  { %v1391_v36 = vmul.f32 %v2565_v35, %v3218_v34 }
0x1111   :  { %v1392_v61 = vadd.f32 %v1391_v36, %v3213_v29 }
0x1113   :  { %2566 = vtanh.f32 %v1392_v61 }
0x111d   :  { %v2567_v11 = vpop.eup %2566 }
0x111e   :  { %1395 = vrot.lane.b32.xlu0 %v2567_v11, %s2807_s0 }
0x1190   :  { %v1396_v12 = vpop.permute.xlu0 %1395 }
0x1191   :  { %v1398_v13 = vmul.f32 %v2565_v35, %v1396_v12 }
0x1193   :  { %1400 = vrot.lane.b32.xlu1 %v1398_v13, %s2807_s0 }
0x1205   :  { %v1401_v54 = vpop.permute.xlu1 %1400 }
0x1206   :  { %v1403_v48 = vsub.f32 %v2567_v11, %v1401_v54 }
0x1208   :  { %2219 = vmatmul.mubr.msk.f32.vlgmr.msra.gmra.mrb[14].mxu1 %vm382_vm5, %v1403_v48 }
0x1209   :  { %2424 = vmatpush1.bf16.msra.mxu1 %v3224_v50  ;;  %1691 = vmatprep.mubr.f32.mxu1 %v2805_v0 }
0x120a   :  { %2426 = vmatprep.subr.bf16.mxu1 %v3226_v51 }
0x120d   :  { %2428 = vmatpush1.bf16.msra.mxu1 %v3231_v57 }
0x120e   :  { %2430 = vmatprep.subr.bf16.mxu1 %v3235_v58 }
0x1211   :  { %2432 = vmatpush1.bf16.msra.mxu1 %v3239_v59 }
0x1212   :  { %2434 = vmatprep.subr.bf16.mxu1 %v3243_v4 }
0x1215   :  { %2436 = vmatpush1.bf16.msra.mxu1 %v3248_v41 }
0x1216   :  { %2454 = vmatprep.subr.bf16.mxu1 %v3222_v39 }
0x12db   :  { %v1479_v2 = vpop.f32.mrb[14].mxu1 }
0x12dc   :  { %v1485_v45 = vrot.slane %v1479_v2, 6  ;;  %v1481_v19 = vpop.f32.mrb[15].mxu1 }
0x12dd   :  { %v1494_v21 = vadd.f32 %v3218_v34, %v1481_v19 }
0x12de   :  { %v1487_v44 = vadd.f32 %v1485_v45, %v3205_v5 }
0x12df   :  { %v1496_v14 = vrot.slane %v1494_v21, 6 }
0x12e0   :  { %v2220_v3 = vmul.f32 -1.442695, %v1487_v44 }
0x12e2   :  { %2568 = vpow2.f32 %v2220_v3 }
0x12ec   :  { %v2569_v8 = vpop.eup %2568 }
0x12ed   :  { %v1491_v9 = vadd.f32 1.0, %v2569_v8 }
0x12ef   :  { %2570 = vrcp.f32 %v1491_v9 }
0x12f9   :  { %v2571_v15 = vpop.eup %2570 }
0x12fa   :  { %v1498_v22 = vmul.f32 %v2571_v15, %v1496_v14 }
0x12fc   :  { %v1499_v23 = vadd.f32 %v1498_v22, %v3215_v30 }
0x12fe   :  { %2572 = vtanh.f32 %v1499_v23 }
0x1308   :  { %v2573_v24 = vpop.eup %2572 }
0x1309   :  { %v1502_v49 = vrot.slane %v2573_v24, 2 }
0x130b   :  { %v1504_v47 = vsub.f32 %v1403_v48, %v1502_v49 }
0x130d   :  { %v1506_v25 = vrot.slane %v1504_v47, 6 }
0x130f   :  { %1507 = vrot.lane.b32.xlu0 %v1506_v25, %s2807_s0 }
0x1381   :  { %v1508_v18 = vpop.permute.xlu0 %1507 }
0x1382   :  { %v1510_v26 = vmul.f32 %v2571_v15, %v1508_v18 }
0x1384   :  { %1512 = vrot.lane.b32.xlu1 %v1510_v26, %s2807_s0 }
0x13f6   :  { %v1513_v31 = vpop.permute.xlu1 %1512 }
0x13f7   :  { %v1515_v32 = vadd.f32 %v2573_v24, %v1513_v31 }
0x13f9   :  { %v1517_v33 = vrot.slane %v1515_v32, 2 }
0x13fb   :  { %2221 = vmatmul.mubr.msk.f32.vlgmr.msra.gmra.mrb[16].mxu0 %vm382_vm5, %v1517_v33 }
0x13fc   :  { %2440 = vmatpush1.bf16.msra.mxu0 %v3224_v50  ;;  %1806 = vmatprep.mubr.f32.mxu0 %v2805_v0 }
0x13fd   :  { %2442 = vmatprep.subr.bf16.mxu0 %v3226_v51 }
0x1400   :  { %2444 = vmatpush1.bf16.msra.mxu0 %v3231_v57 }
0x1401   :  { %2446 = vmatprep.subr.bf16.mxu0 %v3235_v58 }
0x1404   :  { %2448 = vmatpush1.bf16.msra.mxu0 %v3239_v59 }
0x1405   :  { %2450 = vmatprep.subr.bf16.mxu0 %v3243_v4 }
0x1408   :  { %2452 = vmatpush1.bf16.msra.mxu0 %v3248_v41 }
0x1409   :  { %2470 = vmatprep.subr.bf16.mxu0 %v3222_v39 }
0x14ce   :  { %v1586_v35 = vpop.f32.mrb[16].mxu0 }
0x14cf   :  { %v1592_v36 = vrot.slane %v1586_v35, 4  ;;  %v1588_v61 = vpop.f32.mrb[17].mxu0 }
0x14d0   :  { %v1601_v42 = vadd.f32 %v3218_v34, %v1588_v61 }
0x14d1   :  { %v1594_v37 = vadd.f32 %v1592_v36, %v3203_v20 }
0x14d2   :  { %v1603_v43 = vrot.slane %v1601_v42, 4 }
0x14d3   :  { %v2222_v38 = vmul.f32 -1.442695, %v1594_v37 }
0x14d5   :  { %2574 = vpow2.f32 %v2222_v38 }
0x14df   :  { %v2575_v46 = vpop.eup %2574 }
0x14e0   :  { %v1598_v40 = vadd.f32 1.0, %v2575_v46 }
0x14e2   :  { %2576 = vrcp.f32 %v1598_v40 }
0x14ec   :  { %v2577_v52 = vpop.eup %2576 }
0x14ed   :  { %v1605_v53 = vmul.f32 %v2577_v52, %v1603_v43 }
0x14ef   :  { %v1606_v55 = vadd.f32 %v1605_v53, %v3213_v29 }
0x14f1   :  { %2578 = vtanh.f32 %v1606_v55 }
0x14fb   :  { %v2579_v56 = vpop.eup %2578 }
0x14fc   :  { %v1609_v60 = vrot.slane %v2579_v56, 2 }
0x14fe   :  { %v1611_v62 = vsub.f32 %v1515_v32, %v1609_v60 }
0x1500   :  { %v1613_v63 = vrot.slane %v1611_v62, 6 }
0x1502   :  { %1614 = vrot.lane.b32.xlu0 %v1613_v63, %s2807_s0 }
0x1574   :  { %v1615_v20 = vpop.permute.xlu0 %1614 }
0x1575   :  { %v1617_v1 = vmul.f32 %v2577_v52, %v1615_v20 }
0x1577   :  { %1619 = vrot.lane.b32.xlu1 %v1617_v1, %s2807_s0 }
0x15e9   :  { %v1620_v6 = vpop.permute.xlu1 %1619 }
0x15ea   :  { %v1622_v10 = vadd.f32 %v2579_v56, %v1620_v6 }
0x15ec   :  { %v1624_v11 = vrot.slane %v1622_v10, 4 }
0x15ee   :  { %2223 = vmatmul.mubr.msk.f32.vlgmr.msra.gmra.mrb[16].mxu1 %vm382_vm5, %v1624_v11 }
0x15ef   :  { %2456 = vmatpush1.bf16.msra.mxu1 %v3224_v50  ;;  %1912 = vmatprep.mubr.f32.mxu1 %v2805_v0 }
0x15f0   :  { %2458 = vmatprep.subr.bf16.mxu1 %v3226_v51 }
0x15f3   :  { %2460 = vmatpush1.bf16.msra.mxu1 %v3231_v57 }
0x15f4   :  { %2462 = vmatprep.subr.bf16.mxu1 %v3235_v58 }
0x15f7   :  { %2464 = vmatpush1.bf16.msra.mxu1 %v3239_v59 }
0x15f8   :  { %2466 = vmatprep.subr.bf16.mxu1 %v3243_v4 }
0x15fb   :  { %2468 = vmatpush1.bf16.msra.mxu1 %v3248_v41 }
0x15fc   :  { %2486 = vmatprep.subr.bf16.mxu1 %v3222_v39 }
0x16c1   :  { %v1693_v29 = vpop.f32.mrb[16].mxu1 }
0x16c2   :  { %v1699_v12 = vrot.slane %v1693_v29, 2  ;;  %v1695_v13 = vpop.f32.mrb[17].mxu1 }
0x16c3   :  { %v1708_v19 = vadd.f32 %v3218_v34, %v1695_v13 }
0x16c4   :  { %v1701_v54 = vadd.f32 %v1699_v12, %v3205_v5 }
0x16c5   :  { %v1710_v44 = vrot.slane %v1708_v19, 2 }
0x16c6   :  { %v2224_v48 = vmul.f32 -1.442695, %v1701_v54 }
0x16c8   :  { %2580 = vpow2.f32 %v2224_v48 }
0x16d2   :  { %v2581_v2 = vpop.eup %2580 }
0x16d3   :  { %v1705_v45 = vadd.f32 1.0, %v2581_v2 }
0x16d5   :  { %2582 = vrcp.f32 %v1705_v45 }
0x16df   :  { %v2583_v3 = vpop.eup %2582 }
0x16e0   :  { %v1712_v8 = vmul.f32 %v2583_v3, %v1710_v44 }
0x16e2   :  { %v1713_v9 = vadd.f32 %v1712_v8, %v3215_v30 }
0x16e4   :  { %2584 = vtanh.f32 %v1713_v9 }
0x16ee   :  { %v2585_v21 = vpop.eup %2584 }
0x16ef   :  { %v1716_v39 = vrot.slane %v2585_v21, 2 }
0x16f1   :  { %v1718_v14 = vsub.f32 %v1622_v10, %v1716_v39 }
0x16f3   :  { %v1720_v15 = vrot.slane %v1718_v14, 6 }
0x16f5   :  { %1721 = vrot.lane.b32.xlu0 %v1720_v15, %s2807_s0 }
0x1767   :  { %v1722_v5 = vpop.permute.xlu0 %1721 }
0x1768   :  { %v1724_v22 = vmul.f32 %v2583_v3, %v1722_v5 }
0x176a   :  { %1726 = vrot.lane.b32.xlu1 %v1724_v22, %s2807_s0 }
0x17dc   :  { %v1727_v23 = vpop.permute.xlu1 %1726 }
0x17dd   :  { %v1729_v24 = vadd.f32 %v2585_v21, %v1727_v23 }
0x17df   :  { %v1739_v49 = vrot.slane %v1729_v24, 6 }
0x17e1   :  { %2225 = vmatmul.mubr.msk.f32.vlgmr.msra.gmra.mrb[18].mxu0 %vm382_vm5, %v1739_v49 }
0x17e2   :  { %2472 = vmatpush1.bf16.msra.mxu0 %v3224_v50  ;;  %2019 = vmatprep.mubr.f32.mxu0 %v2805_v0 }
0x17e3   :  { %2474 = vmatprep.subr.bf16.mxu0 %v3226_v51 }
0x17e6   :  { %2476 = vmatpush1.bf16.msra.mxu0 %v3231_v57 }
0x17e7   :  { %2478 = vmatprep.subr.bf16.mxu0 %v3235_v58 }
0x17ea   :  { %2480 = vmatpush1.bf16.msra.mxu0 %v3239_v59 }
0x17eb   :  { %2482 = vmatprep.subr.bf16.mxu0 %v3243_v4 }
0x17ee   :  { %2484 = vmatpush1.bf16.msra.mxu0 %v3248_v41 }
0x18b4   :  { %v1808_v30 = vpop.f32.mrb[18].mxu0 }
0x18b5   :  { %v1813_v47 = vadd.f32 %v1808_v30, %v3207_v7  ;;  %v1810_v25 = vpop.f32.mrb[19].mxu0 }
0x18b6   :  { %v1820_v32 = vadd.f32 %v3218_v34, %v1810_v25 }
0x18b7   :  { %v2226_v18 = vmul.f32 -1.442695, %v1813_v47 }
0x18b9   :  { %2586 = vpow2.f32 %v2226_v18 }
0x18c3   :  { %v2587_v26 = vpop.eup %2586 }
0x18c4   :  { %v1817_v31 = vadd.f32 1.0, %v2587_v26 }
0x18c6   :  { %2588 = vrcp.f32 %v1817_v31 }
0x18d0   :  { %v2589_v33 = vpop.eup %2588 }
0x18d1   :  { %v1821_v35 = vmul.f32 %v2589_v33, %v1820_v32 }
0x18d3   :  { %v1822_v36 = vadd.f32 %v1821_v35, %v3209_v27 }
0x18d5   :  { %2590 = vtanh.f32 %v1822_v36 }
0x18df   :  { %v2591_v61 = vpop.eup %2590 }
0x18e0   :  { %v1825_v37 = vrot.slane %v2591_v61, 2 }
0x18e2   :  { %v1827_v38 = vsub.f32 %v1729_v24, %v1825_v37 }
0x18e4   :  { %v1829_v46 = vrot.slane %v1827_v38, 6 }
0x18e6   :  { %1830 = vrot.lane.b32.xlu0 %v1829_v46, %s2807_s0 }
0x1958   :  { %v1831_v40 = vpop.permute.xlu0 %1830 }
0x1959   :  { %v1833_v42 = vmul.f32 %v2589_v33, %v1831_v40 }
0x195b   :  { %1835 = vrot.lane.b32.xlu1 %v1833_v42, %s2807_s0 }
0x19cd   :  { %v1836_v43 = vpop.permute.xlu1 %1835 }
0x19ce   :  { %v1838_v52 = vadd.f32 %v2591_v61, %v1836_v43 }
0x19d0   :  { %2227 = vmatmul.mubr.msk.f32.vlgmr.msra.gmra.mrb[18].mxu1 %vm382_vm5, %v1838_v52 }
0x19d1   :  { %2488 = vmatpush1.bf16.msra.mxu1 %v3224_v50  ;;  %2126 = vmatprep.mubr.f32.mxu1 %v2805_v0 }
0x19d2   :  { %2490 = vmatprep.subr.bf16.mxu1 %v3226_v51 }
0x19d5   :  { %2492 = vmatpush1.bf16.msra.mxu1 %v3231_v57 }
0x19d6   :  { %2494 = vmatprep.subr.bf16.mxu1 %v3235_v58 }
0x19d9   :  { %2496 = vmatpush1.bf16.msra.mxu1 %v3239_v59 }
0x19da   :  { %2498 = vmatprep.subr.bf16.mxu1 %v3243_v4 }
0x19dd   :  { %2500 = vmatpush1.bf16.msra.mxu1 %v3248_v41 }
0x1aa3   :  { %v1914_v53 = vpop.f32.mrb[18].mxu1 }
0x1aa4   :  { %v1920_v55 = vrot.slane %v1914_v53, 6  ;;  %v1916_v56 = vpop.f32.mrb[19].mxu1 }
0x1aa5   :  { %v1929_v51 = vadd.f32 %v3218_v34, %v1916_v56 }
0x1aa6   :  { %v1922_v60 = vadd.f32 %v1920_v55, %v3201_v17 }
0x1aa7   :  { %v1931_v57 = vrot.slane %v1929_v51, 6 }
0x1aa8   :  { %v2228_v50 = vmul.f32 -1.442695, %v1922_v60 }
0x1aaa   :  { %2592 = vpow2.f32 %v2228_v50 }
0x1ab4   :  { %v2593_v0 = vpop.eup %2592 }
0x1ab5   :  { %v1926_v62 = vadd.f32 1.0, %v2593_v0 }
0x1ab7   :  { %2594 = vrcp.f32 %v1926_v62 }
0x1ac1   :  { %v2595_v58 = vpop.eup %2594 }
0x1ac2   :  { %v1933_v63 = vmul.f32 %v2595_v58, %v1931_v57 }
0x1ac4   :  { %v1934_v59 = vadd.f32 %v1933_v63, %v3211_v28 }
0x1ac6   :  { %2596 = vtanh.f32 %v1934_v59 }
0x1ad0   :  { %v2597_v4 = vpop.eup %2596 }
0x1ad1   :  { %v1937_v41 = vrot.slane %v2597_v4, 2 }
0x1ad3   :  { %v1939_v20 = vsub.f32 %v1838_v52, %v1937_v41 }
0x1ad5   :  { %v1941_v1 = vrot.slane %v1939_v20, 6 }
0x1ad7   :  { %1942 = vrot.lane.b32.xlu0 %v1941_v1, %s2807_s0 }
0x1b49   :  { %v1943_v6 = vpop.permute.xlu0 %1942 }
0x1b4a   :  { %v1945_v10 = vmul.f32 %v2595_v58, %v1943_v6 }
0x1b4c   :  { %1947 = vrot.lane.b32.xlu1 %v1945_v10, %s2807_s0 }
0x1bbe   :  { %v1948_v11 = vpop.permute.xlu1 %1947 }
0x1bbf   :  { %v1950_v29 = vadd.f32 %v2597_v4, %v1948_v11 }
0x1bc1   :  { %v1952_v12 = vrot.slane %v1950_v29, 2 }
0x1bc3   :  { %2229 = vmatmul.mubr.msk.f32.vlgmr.msra.gmra.mrb[20].mxu0 %vm382_vm5, %v1952_v12 }
0x1c96   :  { %v2021_v13 = vpop.f32.mrb[20].mxu0 }
0x1c97   :  { %v2027_v54 = vrot.slane %v2021_v13, 4  ;;  %v2023_v48 = vpop.f32.mrb[21].mxu0 }
0x1c98   :  { %v2036_v3 = vadd.f32 %v3218_v34, %v2023_v48 }
0x1c99   :  { %v2029_v2 = vadd.f32 %v2027_v54, %v3207_v7 }
0x1c9a   :  { %v2038_v8 = vrot.slane %v2036_v3, 4 }
0x1c9b   :  { %v2230_v45 = vmul.f32 -1.442695, %v2029_v2 }
0x1c9d   :  { %2598 = vpow2.f32 %v2230_v45 }
0x1ca7   :  { %v2599_v19 = vpop.eup %2598 }
0x1ca8   :  { %v2033_v44 = vadd.f32 1.0, %v2599_v19 }
0x1caa   :  { %2600 = vrcp.f32 %v2033_v44 }
0x1cb4   :  { %v2601_v9 = vpop.eup %2600 }
0x1cb5   :  { %v2040_v21 = vmul.f32 %v2601_v9, %v2038_v8 }
0x1cb7   :  { %v2041_v39 = vadd.f32 %v2040_v21, %v3209_v27 }
0x1cb9   :  { %2602 = vtanh.f32 %v2041_v39 }
0x1cc3   :  { %v2603_v14 = vpop.eup %2602 }
0x1cc4   :  { %v2044_v15 = vrot.slane %v2603_v14, 2 }
0x1cc6   :  { %v2046_v5 = vsub.f32 %v1950_v29, %v2044_v15 }
0x1cc8   :  { %v2048_v22 = vrot.slane %v2046_v5, 6 }
0x1cca   :  { %2049 = vrot.lane.b32.xlu0 %v2048_v22, %s2807_s0 }
0x1d3c   :  { %v2050_v7 = vpop.permute.xlu0 %2049 }
0x1d3d   :  { %v2052_v23 = vmul.f32 %v2601_v9, %v2050_v7 }
0x1d3f   :  { %2054 = vrot.lane.b32.xlu1 %v2052_v23, %s2807_s0 }
0x1db1   :  { %v2055_v24 = vpop.permute.xlu1 %2054 }
0x1db2   :  { %v2057_v49 = vadd.f32 %v2603_v14, %v2055_v24 }
0x1db4   :  { %v2059_v30 = vrot.slane %v2057_v49, 4 }
0x1db6   :  { %2231 = vmatmul.mubr.msk.f32.vlgmr.msra.gmra.mrb[20].mxu1 %vm382_vm5, %v2059_v30 }
0x1e89   :  { %v2128_v47 = vpop.f32.mrb[20].mxu1 }
0x1e8a   :  { %v2134_v25 = vrot.slane %v2128_v47, 2  ;;  %v2130_v18 = vpop.f32.mrb[21].mxu1 }
0x1e8b   :  { %v2143_v33 = vadd.f32 %v3218_v34, %v2130_v18 }
0x1e8c   :  { %v2136_v27 = vadd.f32 %v2134_v25, %v3201_v17 }
0x1e8d   :  { %v2145_v35 = vrot.slane %v2143_v33, 2 }
0x1e8e   :  { %v2232_v26 = vmul.f32 -1.442695, %v2136_v27 }
0x1e90   :  { %2604 = vpow2.f32 %v2232_v26 }
0x1e9a   :  { %v2605_v31 = vpop.eup %2604 }
0x1e9b   :  { %v2140_v32 = vadd.f32 1.0, %v2605_v31 }
0x1e9d   :  { %2606 = vrcp.f32 %v2140_v32 }
0x1ea7   :  { %v2607_v36 = vpop.eup %2606 }
0x1ea8   :  { %v2147_v61 = vmul.f32 %v2607_v36, %v2145_v35 }
0x1eaa   :  { %v2148_v37 = vadd.f32 %v2147_v61, %v3211_v28 }
0x1eac   :  { %2608 = vtanh.f32 %v2148_v37 }
0x1eb6   :  { %v2609_v38 = vpop.eup %2608 }
0x1eb7   :  { %v2151_v46 = vrot.slane %v2609_v38, 2 }
0x1eb9   :  { %v2153_v40 = vsub.f32 %v2057_v49, %v2151_v46 }
0x1ebb   :  { %v2155_v42 = vrot.slane %v2153_v40, 6 }
0x1ebd   :  { %2156 = vrot.lane.b32.xlu0 %v2155_v42, %s2807_s0 }
0x1f2f   :  { %v2157_v17 = vpop.permute.xlu0 %2156 }
0x1f30   :  { %v2159_v43 = vmul.f32 %v2607_v36, %v2157_v17 }
0x1f32   :  { %2161 = vrot.lane.b32.xlu1 %v2159_v43, %s2807_s0 }
0x1fa4   :  { %v2162_v52 = vpop.permute.xlu1 %2161 }
0x1fa5   :  { %v2164_v53 = vadd.f32 %v2609_v38, %v2162_v52 }
0x1fa7   :  { %2166 = vrot.lane.b32.xlu0 %v2164_v53, %s2807_s0 }
0x2019   :  { %v2167_v34 = vpop.permute.xlu0 %2166 }
0x201a   :  { %v2169_v28 = vsel %vm382_vm5, %v3187_v16, %v2167_v34 }
0x201b   :  { %2170 = vst [vmem:[#allocation15 - $0x6] sm:$0xc0] %v2169_v28 }
0x201c   :  { %2775 = shalt.err (!%p2772_p4)
}
0x201d   :  { %s2776_s8 = scalar_lea.hbm %s3369_s11, 32 }
0x201e   :  { %p2777_p5 = scmp.ne.s32.totalorder %s3369_s11, %s2776_s8  ;;  %p2780_p6 = scmp.lt.u32.totalorder %s2776_s8, %s3369_s11 }
0x2020   :  { %p2782_p7 = pnand %p2780_p6, %p2777_p5 }
0x2022   :  { %2785 = shalt.err (!%p2782_p7)
}
0x2023   :  { %2180 = dma.vmem_to_hbm [thread:$0]  %s2178_s12, 32, %s3369_s11, [#allocation5]  }
0x2024   :  { %2794 = dma.done.wait [#allocation5], 32  }
0x2025   :  { %2795 = vsyncadd [#allocation5], 4294967264 }
0x2026   :  { %2184 = vsyncpa [#allocation4], 1 }
0x2027   :  { %2185 = vsyncpa [#allocation7], 1 }
0x2028   :  { %2186 = vsyncpa [#allocation10], 1 }
0x2029   :  { %2187 = vsyncpa [#allocation13], 1 }
0x202a   :  { %2188 = vsyncpa [#allocation5], 1 }

</bundles_post_ra>
